<compile_context>
chip_gen: v7x
topology: tpu7x:2x2x1
jax: 0.10.0
libtpu: 0.0.40
codegen_flags: <defaults>
</compile_context>

<pallas_src>
import functools

import jax
import jax.numpy as jnp
from jax.experimental import pallas as pl
from jax.experimental.pallas import tpu as pltpu


def _round_up(x, m):
    return (x + m - 1) // m * m


def lstm_fused_kernel(x_ref, wih_ref, whh_ref, b_ref, wfc_ref, bfc_ref,
                      out_ref, gx_sc, h_sc, c_sc, *, seq_len, batch_pad):
    Hp = whh_ref.shape[0]  # padded hidden size (multiple of 128)

    # ---- Phase 0: input projection for ALL timesteps as one large MXU matmul.
    # x_ref: (T*Bp, Dp) bf16, wih_ref: (Dp, 4*Hp) bf16. Bias is folded in here so the
    # serial recurrence below never re-broadcasts it.
    gx_sc[...] = (
        jnp.dot(x_ref[...], wih_ref[...], preferred_element_type=jnp.float32)
        + b_ref[...])

    h_sc[...] = jnp.zeros_like(h_sc)
    c_sc[...] = jnp.zeros_like(c_sc)

    def sigmoid(z):
        # One EUP op (tanh) instead of exp + reciprocal.
        return 0.5 * jnp.tanh(0.5 * z) + 0.5

    # ---- Phase 1: serial recurrence, only h @ W_hh^T per step (f32 state, bf16 matmul).
    def step(t, carry):
        h = h_sc[...]
        row0 = pl.multiple_of(t * batch_pad, batch_pad)
        gates = (gx_sc[pl.ds(row0, batch_pad), :]
                 + jnp.dot(h.astype(whh_ref.dtype), whh_ref[...],
                           preferred_element_type=jnp.float32))
        # Gate slices are whole 128-lane-aligned chunks (Hp is a multiple of 128).
        i_g = sigmoid(gates[:, 0 * Hp:1 * Hp])
        f_g = sigmoid(gates[:, 1 * Hp:2 * Hp])
        g_g = jnp.tanh(gates[:, 2 * Hp:3 * Hp])
        o_g = sigmoid(gates[:, 3 * Hp:4 * Hp])
        c_new = f_g * c_sc[...] + i_g * g_g
        c_sc[...] = c_new
        h_sc[...] = o_g * jnp.tanh(c_new)
        return carry

    jax.lax.fori_loop(0, seq_len, step, 0, unroll=True)

    # ---- Phase 2: classifier on the last hidden state (lane-dense padded output).
    out_ref[...] = (
        jnp.dot(h_sc[...].astype(wfc_ref.dtype), wfc_ref[...],
                preferred_element_type=jnp.float32)
        + bfc_ref[...]).astype(out_ref.dtype)


def lstm_classifier_forward(x, w_ih, w_hh, b_ih, b_hh, w_fc, b_fc):
    """x: (B, input_dim, seq_len) -- matches the PyTorch module's forward input."""
    B, D, T = x.shape
    H = w_hh.shape[1]
    O = w_fc.shape[0]

    Bp = _round_up(B, 8)      # f32 sublane tile
    Dp = _round_up(D, 128)    # lane tile
    Hp = _round_up(H, 128)    # lane tile (per gate block)
    Op = _round_up(O, 128)    # lane-dense output

    # ---- Glue (plain JAX): permute (B,D,T)->(T,B,D), zero-pad, flatten to (T*Bp, Dp).
    x_tbd = jnp.transpose(x, (2, 0, 1))
    x_pad = jnp.zeros((T, Bp, Dp), jnp.float32).at[:, :B, :D].set(x_tbd)
    x_flat = x_pad.reshape(T * Bp, Dp).astype(jnp.bfloat16)

    # Pad each of the 4 gate blocks ([i, f, g, o], PyTorch order) separately so every
    # in-kernel gate slice is lane-aligned. Zero padding keeps padded hidden units inert.
    def pad_gate_weight(w, in_dim, in_dim_p):
        w4 = w.reshape(4, H, in_dim)
        w4p = jnp.zeros((4, Hp, in_dim_p), jnp.float32).at[:, :H, :in_dim].set(w4)
        return w4p.reshape(4 * Hp, in_dim_p)

    wih_t = pad_gate_weight(w_ih, D, Dp).T.astype(jnp.bfloat16)   # (Dp, 4Hp)
    whh_t = pad_gate_weight(w_hh, H, Hp).T.astype(jnp.bfloat16)   # (Hp, 4Hp)

    b4 = (b_ih + b_hh).reshape(4, H)
    b = jnp.zeros((4, Hp), jnp.float32).at[:, :H].set(b4).reshape(1, 4 * Hp)

    wfc_t = (jnp.zeros((Op, Hp), jnp.float32).at[:O, :H].set(w_fc)
             .T.astype(jnp.bfloat16))                             # (Hp, Op)
    bfc = jnp.zeros((1, Op), jnp.float32).at[0, :O].set(b_fc)     # (1, Op)

    kernel = functools.partial(lstm_fused_kernel, seq_len=T, batch_pad=Bp)

    # Whole (tiny) problem handled in one grid step: all weights/activations fit in VMEM
    # with huge headroom, every input is fetched exactly once (no double-buffer waste).
    # TODO(synk): for long sequences / large batches, block T along a grid axis and shard
    # batch blocks across TensorCores with a leading "parallel" axis (v7x).
    grid_spec = pltpu.PrefetchScalarGridSpec(
        num_scalar_prefetch=0,
        grid=(1,),
        in_specs=[
            pl.BlockSpec((T * Bp, Dp), lambda i: (0, 0)),     # x, flattened over (T, B)
            pl.BlockSpec((Dp, 4 * Hp), lambda i: (0, 0)),     # W_ih^T
            pl.BlockSpec((Hp, 4 * Hp), lambda i: (0, 0)),     # W_hh^T
            pl.BlockSpec((1, 4 * Hp), lambda i: (0, 0)),      # fused, gate-padded bias
            pl.BlockSpec((Hp, Op), lambda i: (0, 0)),         # W_fc^T
            pl.BlockSpec((1, Op), lambda i: (0, 0)),          # b_fc
        ],
        out_specs=pl.BlockSpec((Bp, Op), lambda i: (0, 0)),
        scratch_shapes=[
            pltpu.VMEM((T * Bp, 4 * Hp), jnp.float32),  # hoisted gates_x
            pltpu.VMEM((Bp, Hp), jnp.float32),          # h state
            pltpu.VMEM((Bp, Hp), jnp.float32),          # c state
        ],
    )

    out_pad = pl.pallas_call(
        kernel,
        out_shape=jax.ShapeDtypeStruct((Bp, Op), jnp.float32),
        grid_spec=grid_spec,
        compiler_params=pltpu.CompilerParams(
            dimension_semantics=("arbitrary",),       # single sequential grid step
            vmem_limit_bytes=32 * 1024 * 1024),       # explicit budget, safe on v5e/v6e/v7x
    )(x_flat, wih_t, whh_t, b, wfc_t, bfc)

    return out_pad[:B, :O]


def lstm_classifier_reference(x, w_ih, w_hh, b_ih, b_hh, w_fc, b_fc):
    """Pure-JAX f32 reference mirroring torch.nn.LSTM (batch_first) + nn.Linear."""
    B, D, T = x.shape
    H = w_hh.shape[1]
    x_btd = jnp.transpose(x, (0, 2, 1))  # (B, T, D)

    def step(carry, x_t):
        h, c = carry
        gates = x_t @ w_ih.T + b_ih + h @ w_hh.T + b_hh
        i = jax.nn.sigmoid(gates[:, 0:H])
        f = jax.nn.sigmoid(gates[:, H:2 * H])
        g = jnp.tanh(gates[:, 2 * H:3 * H])
        o = jax.nn.sigmoid(gates[:, 3 * H:4 * H])
        c = f * c + i * g
        h = o * jnp.tanh(c)
        return (h, c), h

    h0 = jnp.zeros((B, H), jnp.float32)
    c0 = jnp.zeros((B, H), jnp.float32)
    (hT, _), _ = jax.lax.scan(step, (h0, c0), jnp.transpose(x_btd, (1, 0, 2)))
    return hT @ w_fc.T + b_fc


if __name__ == "__main__":
    B, input_dim, seq_len = 2, 16, 8
    hidden_dim, output_dim = 32, 4

    key = jax.random.PRNGKey(0)
    ks = jax.random.split(key, 8)
    bound = 1.0 / jnp.sqrt(hidden_dim)

    # Deterministic PyTorch-style uniform(-1/sqrt(H), 1/sqrt(H)) init.
    w_ih = jax.random.uniform(ks[0], (4 * hidden_dim, input_dim), jnp.float32, -bound, bound)
    w_hh = jax.random.uniform(ks[1], (4 * hidden_dim, hidden_dim), jnp.float32, -bound, bound)
    b_ih = jax.random.uniform(ks[2], (4 * hidden_dim,), jnp.float32, -bound, bound)
    b_hh = jax.random.uniform(ks[3], (4 * hidden_dim,), jnp.float32, -bound, bound)
    w_fc = jax.random.uniform(ks[4], (output_dim, hidden_dim), jnp.float32, -bound, bound)
    b_fc = jax.random.uniform(ks[5], (output_dim,), jnp.float32, -bound, bound)

    # Module forward input: (B, input_dim, seq_len)
    x = jax.random.normal(ks[6], (B, input_dim, seq_len), jnp.float32)

    out = lstm_classifier_forward(x, w_ih, w_hh, b_ih, b_hh, w_fc, b_fc)
    out = jax.block_until_ready(out)

    ref = lstm_classifier_reference(x, w_ih, w_hh, b_ih, b_hh, w_fc, b_fc)
    assert out.shape == (B, output_dim)
    assert jnp.all(jnp.isfinite(out))
    # bf16 weights/inputs on the MXU (f32 accumulation) -> bf16-level tolerance vs f32 ref.
    assert jnp.allclose(out, ref, atol=5e-2, rtol=5e-2), (out, ref)

    print("KERNEL_OK")
</pallas_src>

<mosaic_0001>
module attributes {stable_mosaic.version = 11 : i64} {
  func.func @lstm_fused_kernel(%arg0: i32, %arg1: memref<64x128xbf16, #tpu.memory_space<vmem>>, %arg2: memref<128x512xbf16, #tpu.memory_space<vmem>>, %arg3: memref<128x512xbf16, #tpu.memory_space<vmem>>, %arg4: memref<1x512xf32, #tpu.memory_space<vmem>>, %arg5: memref<128x128xbf16, #tpu.memory_space<vmem>>, %arg6: memref<1x128xf32, #tpu.memory_space<vmem>>, %arg7: memref<8x128xf32, #tpu.memory_space<vmem>>, %arg8: memref<64x512xf32, #tpu.memory_space<vmem>>, %arg9: memref<8x128xf32, #tpu.memory_space<vmem>>, %arg10: memref<8x128xf32, #tpu.memory_space<vmem>>) attributes {dimension_semantics = [#tpu.dimension_semantics<arbitrary>], iteration_bounds = array<i64: 1>, scalar_prefetch = 0 : i64, scratch_operands = 3 : i64, tpu.core_type = #tpu.core_type<tc>, window_params = [{pipeline_mode = #tpu.pipeline_mode<synchronous>, transform_indices = @transform_0, window_bounds = array<i64: 64, 128>}, {pipeline_mode = #tpu.pipeline_mode<synchronous>, transform_indices = @transform_1, window_bounds = array<i64: 128, 512>}, {pipeline_mode = #tpu.pipeline_mode<synchronous>, transform_indices = @transform_2, window_bounds = array<i64: 128, 512>}, {pipeline_mode = #tpu.pipeline_mode<synchronous>, transform_indices = @transform_3, window_bounds = array<i64: 1, 512>}, {pipeline_mode = #tpu.pipeline_mode<synchronous>, transform_indices = @transform_4, window_bounds = array<i64: 128, 128>}, {pipeline_mode = #tpu.pipeline_mode<synchronous>, transform_indices = @transform_5, window_bounds = array<i64: 1, 128>}, {pipeline_mode = #tpu.pipeline_mode<synchronous>, transform_indices = @transform_6, window_bounds = array<i64: 8, 128>}]} {
    %c0 = arith.constant 0 : index
    %c0_0 = arith.constant 0 : index
    %0 = vector.load %arg1[%c0, %c0_0] : memref<64x128xbf16, #tpu.memory_space<vmem>>, vector<64x128xbf16>
    %c0_1 = arith.constant 0 : index
    %c0_2 = arith.constant 0 : index
    %1 = vector.load %arg2[%c0_1, %c0_2] : memref<128x512xbf16, #tpu.memory_space<vmem>>, vector<128x512xbf16>
    %cst = arith.constant dense<0.000000e+00> : vector<64x512xf32>
    %2 = tpu.matmul %0, %1, %cst {dimension_numbers = #tpu.dot_dimension_numbers<[1], [0], [0], [1], [0, 0, 1, 1], [], []>} : vector<64x128xbf16>, vector<128x512xbf16>, vector<64x512xf32> -> vector<64x512xf32>
    %c0_3 = arith.constant 0 : index
    %c0_4 = arith.constant 0 : index
    %3 = vector.load %arg4[%c0_3, %c0_4] : memref<1x512xf32, #tpu.memory_space<vmem>>, vector<1x512xf32>
    %4 = vector.broadcast %3 : vector<1x512xf32> to vector<64x512xf32>
    %5 = arith.addf %2, %4 : vector<64x512xf32>
    %c0_5 = arith.constant 0 : index
    %c0_6 = arith.constant 0 : index
    %6 = vector.load %arg8[%c0_5, %c0_6] : memref<64x512xf32, #tpu.memory_space<vmem>>, vector<64x512xf32>
    tpu.vector_store %arg8[%c0_5, %c0_6], %5 {strides = array<i32>} : memref<64x512xf32, #tpu.memory_space<vmem>>, vector<64x512xf32>,
    %cst_7 = arith.constant 0.000000e+00 : f32
    %7 = vector.broadcast %cst_7 : f32 to vector<8x128xf32>
    %c0_8 = arith.constant 0 : index
    %c0_9 = arith.constant 0 : index
    %8 = vector.load %arg9[%c0_8, %c0_9] : memref<8x128xf32, #tpu.memory_space<vmem>>, vector<8x128xf32>
    tpu.vector_store %arg9[%c0_8, %c0_9], %7 {strides = array<i32>} : memref<8x128xf32, #tpu.memory_space<vmem>>, vector<8x128xf32>,
    %cst_10 = arith.constant 0.000000e+00 : f32
    %9 = vector.broadcast %cst_10 : f32 to vector<8x128xf32>
    %c0_11 = arith.constant 0 : index
    %c0_12 = arith.constant 0 : index
    %10 = vector.load %arg10[%c0_11, %c0_12] : memref<8x128xf32, #tpu.memory_space<vmem>>, vector<8x128xf32>
    tpu.vector_store %arg10[%c0_11, %c0_12], %9 {strides = array<i32>} : memref<8x128xf32, #tpu.memory_space<vmem>>, vector<8x128xf32>,
    %c0_i32 = arith.constant 0 : i32
    %c0_13 = arith.constant 0 : index
    %c0_14 = arith.constant 0 : index
    %11 = vector.load %arg9[%c0_13, %c0_14] : memref<8x128xf32, #tpu.memory_space<vmem>>, vector<8x128xf32>
    %c8_i32 = arith.constant 8 : i32
    %12 = arith.muli %c0_i32, %c8_i32 : i32
    %13 = tpu.assume_multiple %12, 8 : i32
    %14 = arith.index_cast %13 : i32 to index
    %c0_15 = arith.constant 0 : index
    %15 = vector.load %arg8[%14, %c0_15] : memref<64x512xf32, #tpu.memory_space<vmem>>, vector<8x512xf32>
    %16 = arith.truncf %11 : vector<8x128xf32> to vector<8x128xbf16>
    %c0_16 = arith.constant 0 : index
    %c0_17 = arith.constant 0 : index
    %17 = vector.load %arg3[%c0_16, %c0_17] : memref<128x512xbf16, #tpu.memory_space<vmem>>, vector<128x512xbf16>
    %cst_18 = arith.constant dense<0.000000e+00> : vector<8x512xf32>
    %18 = tpu.matmul %16, %17, %cst_18 {dimension_numbers = #tpu.dot_dimension_numbers<[1], [0], [0], [1], [0, 0, 1, 1], [], []>} : vector<8x128xbf16>, vector<128x512xbf16>, vector<8x512xf32> -> vector<8x512xf32>
    %19 = arith.addf %15, %18 : vector<8x512xf32>
    %20 = vector.extract_strided_slice %19 {offsets = [0, 0], sizes = [8, 128], strides = [1, 1]} : vector<8x512xf32> to vector<8x128xf32>
    %cst_19 = arith.constant 5.000000e-01 : f32
    %21 = vector.broadcast %cst_19 : f32 to vector<8x128xf32>
    %22 = arith.mulf %21, %20 : vector<8x128xf32>
    %23 = math.tanh %22 : vector<8x128xf32>
    %cst_20 = arith.constant 5.000000e-01 : f32
    %24 = vector.broadcast %cst_20 : f32 to vector<8x128xf32>
    %25 = arith.mulf %24, %23 : vector<8x128xf32>
    %cst_21 = arith.constant 5.000000e-01 : f32
    %26 = vector.broadcast %cst_21 : f32 to vector<8x128xf32>
    %27 = arith.addf %25, %26 : vector<8x128xf32>
    %28 = vector.extract_strided_slice %19 {offsets = [0, 128], sizes = [8, 128], strides = [1, 1]} : vector<8x512xf32> to vector<8x128xf32>
    %cst_22 = arith.constant 5.000000e-01 : f32
    %29 = vector.broadcast %cst_22 : f32 to vector<8x128xf32>
    %30 = arith.mulf %29, %28 : vector<8x128xf32>
    %31 = math.tanh %30 : vector<8x128xf32>
    %cst_23 = arith.constant 5.000000e-01 : f32
    %32 = vector.broadcast %cst_23 : f32 to vector<8x128xf32>
    %33 = arith.mulf %32, %31 : vector<8x128xf32>
    %cst_24 = arith.constant 5.000000e-01 : f32
    %34 = vector.broadcast %cst_24 : f32 to vector<8x128xf32>
    %35 = arith.addf %33, %34 : vector<8x128xf32>
    %36 = vector.extract_strided_slice %19 {offsets = [0, 256], sizes = [8, 128], strides = [1, 1]} : vector<8x512xf32> to vector<8x128xf32>
    %37 = math.tanh %36 : vector<8x128xf32>
    %38 = vector.extract_strided_slice %19 {offsets = [0, 384], sizes = [8, 128], strides = [1, 1]} : vector<8x512xf32> to vector<8x128xf32>
    %cst_25 = arith.constant 5.000000e-01 : f32
    %39 = vector.broadcast %cst_25 : f32 to vector<8x128xf32>
    %40 = arith.mulf %39, %38 : vector<8x128xf32>
    %41 = math.tanh %40 : vector<8x128xf32>
    %cst_26 = arith.constant 5.000000e-01 : f32
    %42 = vector.broadcast %cst_26 : f32 to vector<8x128xf32>
    %43 = arith.mulf %42, %41 : vector<8x128xf32>
    %cst_27 = arith.constant 5.000000e-01 : f32
    %44 = vector.broadcast %cst_27 : f32 to vector<8x128xf32>
    %45 = arith.addf %43, %44 : vector<8x128xf32>
    %c0_28 = arith.constant 0 : index
    %c0_29 = arith.constant 0 : index
    %46 = vector.load %arg10[%c0_28, %c0_29] : memref<8x128xf32, #tpu.memory_space<vmem>>, vector<8x128xf32>
    %47 = arith.mulf %35, %46 : vector<8x128xf32>
    %48 = arith.mulf %27, %37 : vector<8x128xf32>
    %49 = arith.addf %47, %48 : vector<8x128xf32>
    %c0_30 = arith.constant 0 : index
    %c0_31 = arith.constant 0 : index
    %50 = vector.load %arg10[%c0_30, %c0_31] : memref<8x128xf32, #tpu.memory_space<vmem>>, vector<8x128xf32>
    tpu.vector_store %arg10[%c0_30, %c0_31], %49 {strides = array<i32>} : memref<8x128xf32, #tpu.memory_space<vmem>>, vector<8x128xf32>,
    %51 = math.tanh %49 : vector<8x128xf32>
    %52 = arith.mulf %45, %51 : vector<8x128xf32>
    %c0_32 = arith.constant 0 : index
    %c0_33 = arith.constant 0 : index
    %53 = vector.load %arg9[%c0_32, %c0_33] : memref<8x128xf32, #tpu.memory_space<vmem>>, vector<8x128xf32>
    tpu.vector_store %arg9[%c0_32, %c0_33], %52 {strides = array<i32>} : memref<8x128xf32, #tpu.memory_space<vmem>>, vector<8x128xf32>,
    %c1_i32 = arith.constant 1 : i32
    %c0_34 = arith.constant 0 : index
    %c0_35 = arith.constant 0 : index
    %54 = vector.load %arg9[%c0_34, %c0_35] : memref<8x128xf32, #tpu.memory_space<vmem>>, vector<8x128xf32>
    %c8_i32_36 = arith.constant 8 : i32
    %55 = arith.muli %c1_i32, %c8_i32_36 : i32
    %56 = tpu.assume_multiple %55, 8 : i32
    %57 = arith.index_cast %56 : i32 to index
    %c0_37 = arith.constant 0 : index
    %58 = vector.load %arg8[%57, %c0_37] : memref<64x512xf32, #tpu.memory_space<vmem>>, vector<8x512xf32>
    %59 = arith.truncf %54 : vector<8x128xf32> to vector<8x128xbf16>
    %c0_38 = arith.constant 0 : index
    %c0_39 = arith.constant 0 : index
    %60 = vector.load %arg3[%c0_38, %c0_39] : memref<128x512xbf16, #tpu.memory_space<vmem>>, vector<128x512xbf16>
    %cst_40 = arith.constant dense<0.000000e+00> : vector<8x512xf32>
    %61 = tpu.matmul %59, %60, %cst_40 {dimension_numbers = #tpu.dot_dimension_numbers<[1], [0], [0], [1], [0, 0, 1, 1], [], []>} : vector<8x128xbf16>, vector<128x512xbf16>, vector<8x512xf32> -> vector<8x512xf32>
    %62 = arith.addf %58, %61 : vector<8x512xf32>
    %63 = vector.extract_strided_slice %62 {offsets = [0, 0], sizes = [8, 128], strides = [1, 1]} : vector<8x512xf32> to vector<8x128xf32>
    %cst_41 = arith.constant 5.000000e-01 : f32
    %64 = vector.broadcast %cst_41 : f32 to vector<8x128xf32>
    %65 = arith.mulf %64, %63 : vector<8x128xf32>
    %66 = math.tanh %65 : vector<8x128xf32>
    %cst_42 = arith.constant 5.000000e-01 : f32
    %67 = vector.broadcast %cst_42 : f32 to vector<8x128xf32>
    %68 = arith.mulf %67, %66 : vector<8x128xf32>
    %cst_43 = arith.constant 5.000000e-01 : f32
    %69 = vector.broadcast %cst_43 : f32 to vector<8x128xf32>
    %70 = arith.addf %68, %69 : vector<8x128xf32>
    %71 = vector.extract_strided_slice %62 {offsets = [0, 128], sizes = [8, 128], strides = [1, 1]} : vector<8x512xf32> to vector<8x128xf32>
    %cst_44 = arith.constant 5.000000e-01 : f32
    %72 = vector.broadcast %cst_44 : f32 to vector<8x128xf32>
    %73 = arith.mulf %72, %71 : vector<8x128xf32>
    %74 = math.tanh %73 : vector<8x128xf32>
    %cst_45 = arith.constant 5.000000e-01 : f32
    %75 = vector.broadcast %cst_45 : f32 to vector<8x128xf32>
    %76 = arith.mulf %75, %74 : vector<8x128xf32>
    %cst_46 = arith.constant 5.000000e-01 : f32
    %77 = vector.broadcast %cst_46 : f32 to vector<8x128xf32>
    %78 = arith.addf %76, %77 : vector<8x128xf32>
    %79 = vector.extract_strided_slice %62 {offsets = [0, 256], sizes = [8, 128], strides = [1, 1]} : vector<8x512xf32> to vector<8x128xf32>
    %80 = math.tanh %79 : vector<8x128xf32>
    %81 = vector.extract_strided_slice %62 {offsets = [0, 384], sizes = [8, 128], strides = [1, 1]} : vector<8x512xf32> to vector<8x128xf32>
    %cst_47 = arith.constant 5.000000e-01 : f32
    %82 = vector.broadcast %cst_47 : f32 to vector<8x128xf32>
    %83 = arith.mulf %82, %81 : vector<8x128xf32>
    %84 = math.tanh %83 : vector<8x128xf32>
    %cst_48 = arith.constant 5.000000e-01 : f32
    %85 = vector.broadcast %cst_48 : f32 to vector<8x128xf32>
    %86 = arith.mulf %85, %84 : vector<8x128xf32>
    %cst_49 = arith.constant 5.000000e-01 : f32
    %87 = vector.broadcast %cst_49 : f32 to vector<8x128xf32>
    %88 = arith.addf %86, %87 : vector<8x128xf32>
    %c0_50 = arith.constant 0 : index
    %c0_51 = arith.constant 0 : index
    %89 = vector.load %arg10[%c0_50, %c0_51] : memref<8x128xf32, #tpu.memory_space<vmem>>, vector<8x128xf32>
    %90 = arith.mulf %78, %89 : vector<8x128xf32>
    %91 = arith.mulf %70, %80 : vector<8x128xf32>
    %92 = arith.addf %90, %91 : vector<8x128xf32>
    %c0_52 = arith.constant 0 : index
    %c0_53 = arith.constant 0 : index
    %93 = vector.load %arg10[%c0_52, %c0_53] : memref<8x128xf32, #tpu.memory_space<vmem>>, vector<8x128xf32>
    tpu.vector_store %arg10[%c0_52, %c0_53], %92 {strides = array<i32>} : memref<8x128xf32, #tpu.memory_space<vmem>>, vector<8x128xf32>,
    %94 = math.tanh %92 : vector<8x128xf32>
    %95 = arith.mulf %88, %94 : vector<8x128xf32>
    %c0_54 = arith.constant 0 : index
    %c0_55 = arith.constant 0 : index
    %96 = vector.load %arg9[%c0_54, %c0_55] : memref<8x128xf32, #tpu.memory_space<vmem>>, vector<8x128xf32>
    tpu.vector_store %arg9[%c0_54, %c0_55], %95 {strides = array<i32>} : memref<8x128xf32, #tpu.memory_space<vmem>>, vector<8x128xf32>,
    %c2_i32 = arith.constant 2 : i32
    %c0_56 = arith.constant 0 : index
    %c0_57 = arith.constant 0 : index
    %97 = vector.load %arg9[%c0_56, %c0_57] : memref<8x128xf32, #tpu.memory_space<vmem>>, vector<8x128xf32>
    %c8_i32_58 = arith.constant 8 : i32
    %98 = arith.muli %c2_i32, %c8_i32_58 : i32
    %99 = tpu.assume_multiple %98, 8 : i32
    %100 = arith.index_cast %99 : i32 to index
    %c0_59 = arith.constant 0 : index
    %101 = vector.load %arg8[%100, %c0_59] : memref<64x512xf32, #tpu.memory_space<vmem>>, vector<8x512xf32>
    %102 = arith.truncf %97 : vector<8x128xf32> to vector<8x128xbf16>
    %c0_60 = arith.constant 0 : index
    %c0_61 = arith.constant 0 : index
    %103 = vector.load %arg3[%c0_60, %c0_61] : memref<128x512xbf16, #tpu.memory_space<vmem>>, vector<128x512xbf16>
    %cst_62 = arith.constant dense<0.000000e+00> : vector<8x512xf32>
    %104 = tpu.matmul %102, %103, %cst_62 {dimension_numbers = #tpu.dot_dimension_numbers<[1], [0], [0], [1], [0, 0, 1, 1], [], []>} : vector<8x128xbf16>, vector<128x512xbf16>, vector<8x512xf32> -> vector<8x512xf32>
    %105 = arith.addf %101, %104 : vector<8x512xf32>
    %106 = vector.extract_strided_slice %105 {offsets = [0, 0], sizes = [8, 128], strides = [1, 1]} : vector<8x512xf32> to vector<8x128xf32>
    %cst_63 = arith.constant 5.000000e-01 : f32
    %107 = vector.broadcast %cst_63 : f32 to vector<8x128xf32>
    %108 = arith.mulf %107, %106 : vector<8x128xf32>
    %109 = math.tanh %108 : vector<8x128xf32>
    %cst_64 = arith.constant 5.000000e-01 : f32
    %110 = vector.broadcast %cst_64 : f32 to vector<8x128xf32>
    %111 = arith.mulf %110, %109 : vector<8x128xf32>
    %cst_65 = arith.constant 5.000000e-01 : f32
    %112 = vector.broadcast %cst_65 : f32 to vector<8x128xf32>
    %113 = arith.addf %111, %112 : vector<8x128xf32>
    %114 = vector.extract_strided_slice %105 {offsets = [0, 128], sizes = [8, 128], strides = [1, 1]} : vector<8x512xf32> to vector<8x128xf32>
    %cst_66 = arith.constant 5.000000e-01 : f32
    %115 = vector.broadcast %cst_66 : f32 to vector<8x128xf32>
    %116 = arith.mulf %115, %114 : vector<8x128xf32>
    %117 = math.tanh %116 : vector<8x128xf32>
    %cst_67 = arith.constant 5.000000e-01 : f32
    %118 = vector.broadcast %cst_67 : f32 to vector<8x128xf32>
    %119 = arith.mulf %118, %117 : vector<8x128xf32>
    %cst_68 = arith.constant 5.000000e-01 : f32
    %120 = vector.broadcast %cst_68 : f32 to vector<8x128xf32>
    %121 = arith.addf %119, %120 : vector<8x128xf32>
    %122 = vector.extract_strided_slice %105 {offsets = [0, 256], sizes = [8, 128], strides = [1, 1]} : vector<8x512xf32> to vector<8x128xf32>
    %123 = math.tanh %122 : vector<8x128xf32>
    %124 = vector.extract_strided_slice %105 {offsets = [0, 384], sizes = [8, 128], strides = [1, 1]} : vector<8x512xf32> to vector<8x128xf32>
    %cst_69 = arith.constant 5.000000e-01 : f32
    %125 = vector.broadcast %cst_69 : f32 to vector<8x128xf32>
    %126 = arith.mulf %125, %124 : vector<8x128xf32>
    %127 = math.tanh %126 : vector<8x128xf32>
    %cst_70 = arith.constant 5.000000e-01 : f32
    %128 = vector.broadcast %cst_70 : f32 to vector<8x128xf32>
    %129 = arith.mulf %128, %127 : vector<8x128xf32>
    %cst_71 = arith.constant 5.000000e-01 : f32
    %130 = vector.broadcast %cst_71 : f32 to vector<8x128xf32>
    %131 = arith.addf %129, %130 : vector<8x128xf32>
    %c0_72 = arith.constant 0 : index
    %c0_73 = arith.constant 0 : index
    %132 = vector.load %arg10[%c0_72, %c0_73] : memref<8x128xf32, #tpu.memory_space<vmem>>, vector<8x128xf32>
    %133 = arith.mulf %121, %132 : vector<8x128xf32>
    %134 = arith.mulf %113, %123 : vector<8x128xf32>
    %135 = arith.addf %133, %134 : vector<8x128xf32>
    %c0_74 = arith.constant 0 : index
    %c0_75 = arith.constant 0 : index
    %136 = vector.load %arg10[%c0_74, %c0_75] : memref<8x128xf32, #tpu.memory_space<vmem>>, vector<8x128xf32>
    tpu.vector_store %arg10[%c0_74, %c0_75], %135 {strides = array<i32>} : memref<8x128xf32, #tpu.memory_space<vmem>>, vector<8x128xf32>,
    %137 = math.tanh %135 : vector<8x128xf32>
    %138 = arith.mulf %131, %137 : vector<8x128xf32>
    %c0_76 = arith.constant 0 : index
    %c0_77 = arith.constant 0 : index
    %139 = vector.load %arg9[%c0_76, %c0_77] : memref<8x128xf32, #tpu.memory_space<vmem>>, vector<8x128xf32>
    tpu.vector_store %arg9[%c0_76, %c0_77], %138 {strides = array<i32>} : memref<8x128xf32, #tpu.memory_space<vmem>>, vector<8x128xf32>,
    %c3_i32 = arith.constant 3 : i32
    %c0_78 = arith.constant 0 : index
    %c0_79 = arith.constant 0 : index
    %140 = vector.load %arg9[%c0_78, %c0_79] : memref<8x128xf32, #tpu.memory_space<vmem>>, vector<8x128xf32>
    %c8_i32_80 = arith.constant 8 : i32
    %141 = arith.muli %c3_i32, %c8_i32_80 : i32
    %142 = tpu.assume_multiple %141, 8 : i32
    %143 = arith.index_cast %142 : i32 to index
    %c0_81 = arith.constant 0 : index
    %144 = vector.load %arg8[%143, %c0_81] : memref<64x512xf32, #tpu.memory_space<vmem>>, vector<8x512xf32>
    %145 = arith.truncf %140 : vector<8x128xf32> to vector<8x128xbf16>
    %c0_82 = arith.constant 0 : index
    %c0_83 = arith.constant 0 : index
    %146 = vector.load %arg3[%c0_82, %c0_83] : memref<128x512xbf16, #tpu.memory_space<vmem>>, vector<128x512xbf16>
    %cst_84 = arith.constant dense<0.000000e+00> : vector<8x512xf32>
    %147 = tpu.matmul %145, %146, %cst_84 {dimension_numbers = #tpu.dot_dimension_numbers<[1], [0], [0], [1], [0, 0, 1, 1], [], []>} : vector<8x128xbf16>, vector<128x512xbf16>, vector<8x512xf32> -> vector<8x512xf32>
    %148 = arith.addf %144, %147 : vector<8x512xf32>
    %149 = vector.extract_strided_slice %148 {offsets = [0, 0], sizes = [8, 128], strides = [1, 1]} : vector<8x512xf32> to vector<8x128xf32>
    %cst_85 = arith.constant 5.000000e-01 : f32
    %150 = vector.broadcast %cst_85 : f32 to vector<8x128xf32>
    %151 = arith.mulf %150, %149 : vector<8x128xf32>
    %152 = math.tanh %151 : vector<8x128xf32>
    %cst_86 = arith.constant 5.000000e-01 : f32
    %153 = vector.broadcast %cst_86 : f32 to vector<8x128xf32>
    %154 = arith.mulf %153, %152 : vector<8x128xf32>
    %cst_87 = arith.constant 5.000000e-01 : f32
    %155 = vector.broadcast %cst_87 : f32 to vector<8x128xf32>
    %156 = arith.addf %154, %155 : vector<8x128xf32>
    %157 = vector.extract_strided_slice %148 {offsets = [0, 128], sizes = [8, 128], strides = [1, 1]} : vector<8x512xf32> to vector<8x128xf32>
    %cst_88 = arith.constant 5.000000e-01 : f32
    %158 = vector.broadcast %cst_88 : f32 to vector<8x128xf32>
    %159 = arith.mulf %158, %157 : vector<8x128xf32>
    %160 = math.tanh %159 : vector<8x128xf32>
    %cst_89 = arith.constant 5.000000e-01 : f32
    %161 = vector.broadcast %cst_89 : f32 to vector<8x128xf32>
    %162 = arith.mulf %161, %160 : vector<8x128xf32>
    %cst_90 = arith.constant 5.000000e-01 : f32
    %163 = vector.broadcast %cst_90 : f32 to vector<8x128xf32>
    %164 = arith.addf %162, %163 : vector<8x128xf32>
    %165 = vector.extract_strided_slice %148 {offsets = [0, 256], sizes = [8, 128], strides = [1, 1]} : vector<8x512xf32> to vector<8x128xf32>
    %166 = math.tanh %165 : vector<8x128xf32>
    %167 = vector.extract_strided_slice %148 {offsets = [0, 384], sizes = [8, 128], strides = [1, 1]} : vector<8x512xf32> to vector<8x128xf32>
    %cst_91 = arith.constant 5.000000e-01 : f32
    %168 = vector.broadcast %cst_91 : f32 to vector<8x128xf32>
    %169 = arith.mulf %168, %167 : vector<8x128xf32>
    %170 = math.tanh %169 : vector<8x128xf32>
    %cst_92 = arith.constant 5.000000e-01 : f32
    %171 = vector.broadcast %cst_92 : f32 to vector<8x128xf32>
    %172 = arith.mulf %171, %170 : vector<8x128xf32>
    %cst_93 = arith.constant 5.000000e-01 : f32
    %173 = vector.broadcast %cst_93 : f32 to vector<8x128xf32>
    %174 = arith.addf %172, %173 : vector<8x128xf32>
    %c0_94 = arith.constant 0 : index
    %c0_95 = arith.constant 0 : index
    %175 = vector.load %arg10[%c0_94, %c0_95] : memref<8x128xf32, #tpu.memory_space<vmem>>, vector<8x128xf32>
    %176 = arith.mulf %164, %175 : vector<8x128xf32>
    %177 = arith.mulf %156, %166 : vector<8x128xf32>
    %178 = arith.addf %176, %177 : vector<8x128xf32>
    %c0_96 = arith.constant 0 : index
    %c0_97 = arith.constant 0 : index
    %179 = vector.load %arg10[%c0_96, %c0_97] : memref<8x128xf32, #tpu.memory_space<vmem>>, vector<8x128xf32>
    tpu.vector_store %arg10[%c0_96, %c0_97], %178 {strides = array<i32>} : memref<8x128xf32, #tpu.memory_space<vmem>>, vector<8x128xf32>,
    %180 = math.tanh %178 : vector<8x128xf32>
    %181 = arith.mulf %174, %180 : vector<8x128xf32>
    %c0_98 = arith.constant 0 : index
    %c0_99 = arith.constant 0 : index
    %182 = vector.load %arg9[%c0_98, %c0_99] : memref<8x128xf32, #tpu.memory_space<vmem>>, vector<8x128xf32>
    tpu.vector_store %arg9[%c0_98, %c0_99], %181 {strides = array<i32>} : memref<8x128xf32, #tpu.memory_space<vmem>>, vector<8x128xf32>,
    %c4_i32 = arith.constant 4 : i32
    %c0_100 = arith.constant 0 : index
    %c0_101 = arith.constant 0 : index
    %183 = vector.load %arg9[%c0_100, %c0_101] : memref<8x128xf32, #tpu.memory_space<vmem>>, vector<8x128xf32>
    %c8_i32_102 = arith.constant 8 : i32
    %184 = arith.muli %c4_i32, %c8_i32_102 : i32
    %185 = tpu.assume_multiple %184, 8 : i32
    %186 = arith.index_cast %185 : i32 to index
    %c0_103 = arith.constant 0 : index
    %187 = vector.load %arg8[%186, %c0_103] : memref<64x512xf32, #tpu.memory_space<vmem>>, vector<8x512xf32>
    %188 = arith.truncf %183 : vector<8x128xf32> to vector<8x128xbf16>
    %c0_104 = arith.constant 0 : index
    %c0_105 = arith.constant 0 : index
    %189 = vector.load %arg3[%c0_104, %c0_105] : memref<128x512xbf16, #tpu.memory_space<vmem>>, vector<128x512xbf16>
    %cst_106 = arith.constant dense<0.000000e+00> : vector<8x512xf32>
    %190 = tpu.matmul %188, %189, %cst_106 {dimension_numbers = #tpu.dot_dimension_numbers<[1], [0], [0], [1], [0, 0, 1, 1], [], []>} : vector<8x128xbf16>, vector<128x512xbf16>, vector<8x512xf32> -> vector<8x512xf32>
    %191 = arith.addf %187, %190 : vector<8x512xf32>
    %192 = vector.extract_strided_slice %191 {offsets = [0, 0], sizes = [8, 128], strides = [1, 1]} : vector<8x512xf32> to vector<8x128xf32>
    %cst_107 = arith.constant 5.000000e-01 : f32
    %193 = vector.broadcast %cst_107 : f32 to vector<8x128xf32>
    %194 = arith.mulf %193, %192 : vector<8x128xf32>
    %195 = math.tanh %194 : vector<8x128xf32>
    %cst_108 = arith.constant 5.000000e-01 : f32
    %196 = vector.broadcast %cst_108 : f32 to vector<8x128xf32>
    %197 = arith.mulf %196, %195 : vector<8x128xf32>
    %cst_109 = arith.constant 5.000000e-01 : f32
    %198 = vector.broadcast %cst_109 : f32 to vector<8x128xf32>
    %199 = arith.addf %197, %198 : vector<8x128xf32>
    %200 = vector.extract_strided_slice %191 {offsets = [0, 128], sizes = [8, 128], strides = [1, 1]} : vector<8x512xf32> to vector<8x128xf32>
    %cst_110 = arith.constant 5.000000e-01 : f32
    %201 = vector.broadcast %cst_110 : f32 to vector<8x128xf32>
    %202 = arith.mulf %201, %200 : vector<8x128xf32>
    %203 = math.tanh %202 : vector<8x128xf32>
    %cst_111 = arith.constant 5.000000e-01 : f32
    %204 = vector.broadcast %cst_111 : f32 to vector<8x128xf32>
    %205 = arith.mulf %204, %203 : vector<8x128xf32>
    %cst_112 = arith.constant 5.000000e-01 : f32
    %206 = vector.broadcast %cst_112 : f32 to vector<8x128xf32>
    %207 = arith.addf %205, %206 : vector<8x128xf32>
    %208 = vector.extract_strided_slice %191 {offsets = [0, 256], sizes = [8, 128], strides = [1, 1]} : vector<8x512xf32> to vector<8x128xf32>
    %209 = math.tanh %208 : vector<8x128xf32>
    %210 = vector.extract_strided_slice %191 {offsets = [0, 384], sizes = [8, 128], strides = [1, 1]} : vector<8x512xf32> to vector<8x128xf32>
    %cst_113 = arith.constant 5.000000e-01 : f32
    %211 = vector.broadcast %cst_113 : f32 to vector<8x128xf32>
    %212 = arith.mulf %211, %210 : vector<8x128xf32>
    %213 = math.tanh %212 : vector<8x128xf32>
    %cst_114 = arith.constant 5.000000e-01 : f32
    %214 = vector.broadcast %cst_114 : f32 to vector<8x128xf32>
    %215 = arith.mulf %214, %213 : vector<8x128xf32>
    %cst_115 = arith.constant 5.000000e-01 : f32
    %216 = vector.broadcast %cst_115 : f32 to vector<8x128xf32>
    %217 = arith.addf %215, %216 : vector<8x128xf32>
    %c0_116 = arith.constant 0 : index
    %c0_117 = arith.constant 0 : index
    %218 = vector.load %arg10[%c0_116, %c0_117] : memref<8x128xf32, #tpu.memory_space<vmem>>, vector<8x128xf32>
    %219 = arith.mulf %207, %218 : vector<8x128xf32>
    %220 = arith.mulf %199, %209 : vector<8x128xf32>
    %221 = arith.addf %219, %220 : vector<8x128xf32>
    %c0_118 = arith.constant 0 : index
    %c0_119 = arith.constant 0 : index
    %222 = vector.load %arg10[%c0_118, %c0_119] : memref<8x128xf32, #tpu.memory_space<vmem>>, vector<8x128xf32>
    tpu.vector_store %arg10[%c0_118, %c0_119], %221 {strides = array<i32>} : memref<8x128xf32, #tpu.memory_space<vmem>>, vector<8x128xf32>,
    %223 = math.tanh %221 : vector<8x128xf32>
    %224 = arith.mulf %217, %223 : vector<8x128xf32>
    %c0_120 = arith.constant 0 : index
    %c0_121 = arith.constant 0 : index
    %225 = vector.load %arg9[%c0_120, %c0_121] : memref<8x128xf32, #tpu.memory_space<vmem>>, vector<8x128xf32>
    tpu.vector_store %arg9[%c0_120, %c0_121], %224 {strides = array<i32>} : memref<8x128xf32, #tpu.memory_space<vmem>>, vector<8x128xf32>,
    %c5_i32 = arith.constant 5 : i32
    %c0_122 = arith.constant 0 : index
    %c0_123 = arith.constant 0 : index
    %226 = vector.load %arg9[%c0_122, %c0_123] : memref<8x128xf32, #tpu.memory_space<vmem>>, vector<8x128xf32>
    %c8_i32_124 = arith.constant 8 : i32
    %227 = arith.muli %c5_i32, %c8_i32_124 : i32
    %228 = tpu.assume_multiple %227, 8 : i32
    %229 = arith.index_cast %228 : i32 to index
    %c0_125 = arith.constant 0 : index
    %230 = vector.load %arg8[%229, %c0_125] : memref<64x512xf32, #tpu.memory_space<vmem>>, vector<8x512xf32>
    %231 = arith.truncf %226 : vector<8x128xf32> to vector<8x128xbf16>
    %c0_126 = arith.constant 0 : index
    %c0_127 = arith.constant 0 : index
    %232 = vector.load %arg3[%c0_126, %c0_127] : memref<128x512xbf16, #tpu.memory_space<vmem>>, vector<128x512xbf16>
    %cst_128 = arith.constant dense<0.000000e+00> : vector<8x512xf32>
    %233 = tpu.matmul %231, %232, %cst_128 {dimension_numbers = #tpu.dot_dimension_numbers<[1], [0], [0], [1], [0, 0, 1, 1], [], []>} : vector<8x128xbf16>, vector<128x512xbf16>, vector<8x512xf32> -> vector<8x512xf32>
    %234 = arith.addf %230, %233 : vector<8x512xf32>
    %235 = vector.extract_strided_slice %234 {offsets = [0, 0], sizes = [8, 128], strides = [1, 1]} : vector<8x512xf32> to vector<8x128xf32>
    %cst_129 = arith.constant 5.000000e-01 : f32
    %236 = vector.broadcast %cst_129 : f32 to vector<8x128xf32>
    %237 = arith.mulf %236, %235 : vector<8x128xf32>
    %238 = math.tanh %237 : vector<8x128xf32>
    %cst_130 = arith.constant 5.000000e-01 : f32
    %239 = vector.broadcast %cst_130 : f32 to vector<8x128xf32>
    %240 = arith.mulf %239, %238 : vector<8x128xf32>
    %cst_131 = arith.constant 5.000000e-01 : f32
    %241 = vector.broadcast %cst_131 : f32 to vector<8x128xf32>
    %242 = arith.addf %240, %241 : vector<8x128xf32>
    %243 = vector.extract_strided_slice %234 {offsets = [0, 128], sizes = [8, 128], strides = [1, 1]} : vector<8x512xf32> to vector<8x128xf32>
    %cst_132 = arith.constant 5.000000e-01 : f32
    %244 = vector.broadcast %cst_132 : f32 to vector<8x128xf32>
    %245 = arith.mulf %244, %243 : vector<8x128xf32>
    %246 = math.tanh %245 : vector<8x128xf32>
    %cst_133 = arith.constant 5.000000e-01 : f32
    %247 = vector.broadcast %cst_133 : f32 to vector<8x128xf32>
    %248 = arith.mulf %247, %246 : vector<8x128xf32>
    %cst_134 = arith.constant 5.000000e-01 : f32
    %249 = vector.broadcast %cst_134 : f32 to vector<8x128xf32>
    %250 = arith.addf %248, %249 : vector<8x128xf32>
    %251 = vector.extract_strided_slice %234 {offsets = [0, 256], sizes = [8, 128], strides = [1, 1]} : vector<8x512xf32> to vector<8x128xf32>
    %252 = math.tanh %251 : vector<8x128xf32>
    %253 = vector.extract_strided_slice %234 {offsets = [0, 384], sizes = [8, 128], strides = [1, 1]} : vector<8x512xf32> to vector<8x128xf32>
    %cst_135 = arith.constant 5.000000e-01 : f32
    %254 = vector.broadcast %cst_135 : f32 to vector<8x128xf32>
    %255 = arith.mulf %254, %253 : vector<8x128xf32>
    %256 = math.tanh %255 : vector<8x128xf32>
    %cst_136 = arith.constant 5.000000e-01 : f32
    %257 = vector.broadcast %cst_136 : f32 to vector<8x128xf32>
    %258 = arith.mulf %257, %256 : vector<8x128xf32>
    %cst_137 = arith.constant 5.000000e-01 : f32
    %259 = vector.broadcast %cst_137 : f32 to vector<8x128xf32>
    %260 = arith.addf %258, %259 : vector<8x128xf32>
    %c0_138 = arith.constant 0 : index
    %c0_139 = arith.constant 0 : index
    %261 = vector.load %arg10[%c0_138, %c0_139] : memref<8x128xf32, #tpu.memory_space<vmem>>, vector<8x128xf32>
    %262 = arith.mulf %250, %261 : vector<8x128xf32>
    %263 = arith.mulf %242, %252 : vector<8x128xf32>
    %264 = arith.addf %262, %263 : vector<8x128xf32>
    %c0_140 = arith.constant 0 : index
    %c0_141 = arith.constant 0 : index
    %265 = vector.load %arg10[%c0_140, %c0_141] : memref<8x128xf32, #tpu.memory_space<vmem>>, vector<8x128xf32>
    tpu.vector_store %arg10[%c0_140, %c0_141], %264 {strides = array<i32>} : memref<8x128xf32, #tpu.memory_space<vmem>>, vector<8x128xf32>,
    %266 = math.tanh %264 : vector<8x128xf32>
    %267 = arith.mulf %260, %266 : vector<8x128xf32>
    %c0_142 = arith.constant 0 : index
    %c0_143 = arith.constant 0 : index
    %268 = vector.load %arg9[%c0_142, %c0_143] : memref<8x128xf32, #tpu.memory_space<vmem>>, vector<8x128xf32>
    tpu.vector_store %arg9[%c0_142, %c0_143], %267 {strides = array<i32>} : memref<8x128xf32, #tpu.memory_space<vmem>>, vector<8x128xf32>,
    %c6_i32 = arith.constant 6 : i32
    %c0_144 = arith.constant 0 : index
    %c0_145 = arith.constant 0 : index
    %269 = vector.load %arg9[%c0_144, %c0_145] : memref<8x128xf32, #tpu.memory_space<vmem>>, vector<8x128xf32>
    %c8_i32_146 = arith.constant 8 : i32
    %270 = arith.muli %c6_i32, %c8_i32_146 : i32
    %271 = tpu.assume_multiple %270, 8 : i32
    %272 = arith.index_cast %271 : i32 to index
    %c0_147 = arith.constant 0 : index
    %273 = vector.load %arg8[%272, %c0_147] : memref<64x512xf32, #tpu.memory_space<vmem>>, vector<8x512xf32>
    %274 = arith.truncf %269 : vector<8x128xf32> to vector<8x128xbf16>
    %c0_148 = arith.constant 0 : index
    %c0_149 = arith.constant 0 : index
    %275 = vector.load %arg3[%c0_148, %c0_149] : memref<128x512xbf16, #tpu.memory_space<vmem>>, vector<128x512xbf16>
    %cst_150 = arith.constant dense<0.000000e+00> : vector<8x512xf32>
    %276 = tpu.matmul %274, %275, %cst_150 {dimension_numbers = #tpu.dot_dimension_numbers<[1], [0], [0], [1], [0, 0, 1, 1], [], []>} : vector<8x128xbf16>, vector<128x512xbf16>, vector<8x512xf32> -> vector<8x512xf32>
    %277 = arith.addf %273, %276 : vector<8x512xf32>
    %278 = vector.extract_strided_slice %277 {offsets = [0, 0], sizes = [8, 128], strides = [1, 1]} : vector<8x512xf32> to vector<8x128xf32>
    %cst_151 = arith.constant 5.000000e-01 : f32
    %279 = vector.broadcast %cst_151 : f32 to vector<8x128xf32>
    %280 = arith.mulf %279, %278 : vector<8x128xf32>
    %281 = math.tanh %280 : vector<8x128xf32>
    %cst_152 = arith.constant 5.000000e-01 : f32
    %282 = vector.broadcast %cst_152 : f32 to vector<8x128xf32>
    %283 = arith.mulf %282, %281 : vector<8x128xf32>
    %cst_153 = arith.constant 5.000000e-01 : f32
    %284 = vector.broadcast %cst_153 : f32 to vector<8x128xf32>
    %285 = arith.addf %283, %284 : vector<8x128xf32>
    %286 = vector.extract_strided_slice %277 {offsets = [0, 128], sizes = [8, 128], strides = [1, 1]} : vector<8x512xf32> to vector<8x128xf32>
    %cst_154 = arith.constant 5.000000e-01 : f32
    %287 = vector.broadcast %cst_154 : f32 to vector<8x128xf32>
    %288 = arith.mulf %287, %286 : vector<8x128xf32>
    %289 = math.tanh %288 : vector<8x128xf32>
    %cst_155 = arith.constant 5.000000e-01 : f32
    %290 = vector.broadcast %cst_155 : f32 to vector<8x128xf32>
    %291 = arith.mulf %290, %289 : vector<8x128xf32>
    %cst_156 = arith.constant 5.000000e-01 : f32
    %292 = vector.broadcast %cst_156 : f32 to vector<8x128xf32>
    %293 = arith.addf %291, %292 : vector<8x128xf32>
    %294 = vector.extract_strided_slice %277 {offsets = [0, 256], sizes = [8, 128], strides = [1, 1]} : vector<8x512xf32> to vector<8x128xf32>
    %295 = math.tanh %294 : vector<8x128xf32>
    %296 = vector.extract_strided_slice %277 {offsets = [0, 384], sizes = [8, 128], strides = [1, 1]} : vector<8x512xf32> to vector<8x128xf32>
    %cst_157 = arith.constant 5.000000e-01 : f32
    %297 = vector.broadcast %cst_157 : f32 to vector<8x128xf32>
    %298 = arith.mulf %297, %296 : vector<8x128xf32>
    %299 = math.tanh %298 : vector<8x128xf32>
    %cst_158 = arith.constant 5.000000e-01 : f32
    %300 = vector.broadcast %cst_158 : f32 to vector<8x128xf32>
    %301 = arith.mulf %300, %299 : vector<8x128xf32>
    %cst_159 = arith.constant 5.000000e-01 : f32
    %302 = vector.broadcast %cst_159 : f32 to vector<8x128xf32>
    %303 = arith.addf %301, %302 : vector<8x128xf32>
    %c0_160 = arith.constant 0 : index
    %c0_161 = arith.constant 0 : index
    %304 = vector.load %arg10[%c0_160, %c0_161] : memref<8x128xf32, #tpu.memory_space<vmem>>, vector<8x128xf32>
    %305 = arith.mulf %293, %304 : vector<8x128xf32>
    %306 = arith.mulf %285, %295 : vector<8x128xf32>
    %307 = arith.addf %305, %306 : vector<8x128xf32>
    %c0_162 = arith.constant 0 : index
    %c0_163 = arith.constant 0 : index
    %308 = vector.load %arg10[%c0_162, %c0_163] : memref<8x128xf32, #tpu.memory_space<vmem>>, vector<8x128xf32>
    tpu.vector_store %arg10[%c0_162, %c0_163], %307 {strides = array<i32>} : memref<8x128xf32, #tpu.memory_space<vmem>>, vector<8x128xf32>,
    %309 = math.tanh %307 : vector<8x128xf32>
    %310 = arith.mulf %303, %309 : vector<8x128xf32>
    %c0_164 = arith.constant 0 : index
    %c0_165 = arith.constant 0 : index
    %311 = vector.load %arg9[%c0_164, %c0_165] : memref<8x128xf32, #tpu.memory_space<vmem>>, vector<8x128xf32>
    tpu.vector_store %arg9[%c0_164, %c0_165], %310 {strides = array<i32>} : memref<8x128xf32, #tpu.memory_space<vmem>>, vector<8x128xf32>,
    %c7_i32 = arith.constant 7 : i32
    %c0_166 = arith.constant 0 : index
    %c0_167 = arith.constant 0 : index
    %312 = vector.load %arg9[%c0_166, %c0_167] : memref<8x128xf32, #tpu.memory_space<vmem>>, vector<8x128xf32>
    %c8_i32_168 = arith.constant 8 : i32
    %313 = arith.muli %c7_i32, %c8_i32_168 : i32
    %314 = tpu.assume_multiple %313, 8 : i32
    %315 = arith.index_cast %314 : i32 to index
    %c0_169 = arith.constant 0 : index
    %316 = vector.load %arg8[%315, %c0_169] : memref<64x512xf32, #tpu.memory_space<vmem>>, vector<8x512xf32>
    %317 = arith.truncf %312 : vector<8x128xf32> to vector<8x128xbf16>
    %c0_170 = arith.constant 0 : index
    %c0_171 = arith.constant 0 : index
    %318 = vector.load %arg3[%c0_170, %c0_171] : memref<128x512xbf16, #tpu.memory_space<vmem>>, vector<128x512xbf16>
    %cst_172 = arith.constant dense<0.000000e+00> : vector<8x512xf32>
    %319 = tpu.matmul %317, %318, %cst_172 {dimension_numbers = #tpu.dot_dimension_numbers<[1], [0], [0], [1], [0, 0, 1, 1], [], []>} : vector<8x128xbf16>, vector<128x512xbf16>, vector<8x512xf32> -> vector<8x512xf32>
    %320 = arith.addf %316, %319 : vector<8x512xf32>
    %321 = vector.extract_strided_slice %320 {offsets = [0, 0], sizes = [8, 128], strides = [1, 1]} : vector<8x512xf32> to vector<8x128xf32>
    %cst_173 = arith.constant 5.000000e-01 : f32
    %322 = vector.broadcast %cst_173 : f32 to vector<8x128xf32>
    %323 = arith.mulf %322, %321 : vector<8x128xf32>
    %324 = math.tanh %323 : vector<8x128xf32>
    %cst_174 = arith.constant 5.000000e-01 : f32
    %325 = vector.broadcast %cst_174 : f32 to vector<8x128xf32>
    %326 = arith.mulf %325, %324 : vector<8x128xf32>
    %cst_175 = arith.constant 5.000000e-01 : f32
    %327 = vector.broadcast %cst_175 : f32 to vector<8x128xf32>
    %328 = arith.addf %326, %327 : vector<8x128xf32>
    %329 = vector.extract_strided_slice %320 {offsets = [0, 128], sizes = [8, 128], strides = [1, 1]} : vector<8x512xf32> to vector<8x128xf32>
    %cst_176 = arith.constant 5.000000e-01 : f32
    %330 = vector.broadcast %cst_176 : f32 to vector<8x128xf32>
    %331 = arith.mulf %330, %329 : vector<8x128xf32>
    %332 = math.tanh %331 : vector<8x128xf32>
    %cst_177 = arith.constant 5.000000e-01 : f32
    %333 = vector.broadcast %cst_177 : f32 to vector<8x128xf32>
    %334 = arith.mulf %333, %332 : vector<8x128xf32>
    %cst_178 = arith.constant 5.000000e-01 : f32
    %335 = vector.broadcast %cst_178 : f32 to vector<8x128xf32>
    %336 = arith.addf %334, %335 : vector<8x128xf32>
    %337 = vector.extract_strided_slice %320 {offsets = [0, 256], sizes = [8, 128], strides = [1, 1]} : vector<8x512xf32> to vector<8x128xf32>
    %338 = math.tanh %337 : vector<8x128xf32>
    %339 = vector.extract_strided_slice %320 {offsets = [0, 384], sizes = [8, 128], strides = [1, 1]} : vector<8x512xf32> to vector<8x128xf32>
    %cst_179 = arith.constant 5.000000e-01 : f32
    %340 = vector.broadcast %cst_179 : f32 to vector<8x128xf32>
    %341 = arith.mulf %340, %339 : vector<8x128xf32>
    %342 = math.tanh %341 : vector<8x128xf32>
    %cst_180 = arith.constant 5.000000e-01 : f32
    %343 = vector.broadcast %cst_180 : f32 to vector<8x128xf32>
    %344 = arith.mulf %343, %342 : vector<8x128xf32>
    %cst_181 = arith.constant 5.000000e-01 : f32
    %345 = vector.broadcast %cst_181 : f32 to vector<8x128xf32>
    %346 = arith.addf %344, %345 : vector<8x128xf32>
    %c0_182 = arith.constant 0 : index
    %c0_183 = arith.constant 0 : index
    %347 = vector.load %arg10[%c0_182, %c0_183] : memref<8x128xf32, #tpu.memory_space<vmem>>, vector<8x128xf32>
    %348 = arith.mulf %336, %347 : vector<8x128xf32>
    %349 = arith.mulf %328, %338 : vector<8x128xf32>
    %350 = arith.addf %348, %349 : vector<8x128xf32>
    %c0_184 = arith.constant 0 : index
    %c0_185 = arith.constant 0 : index
    %351 = vector.load %arg10[%c0_184, %c0_185] : memref<8x128xf32, #tpu.memory_space<vmem>>, vector<8x128xf32>
    tpu.vector_store %arg10[%c0_184, %c0_185], %350 {strides = array<i32>} : memref<8x128xf32, #tpu.memory_space<vmem>>, vector<8x128xf32>,
    %352 = math.tanh %350 : vector<8x128xf32>
    %353 = arith.mulf %346, %352 : vector<8x128xf32>
    %c0_186 = arith.constant 0 : index
    %c0_187 = arith.constant 0 : index
    %354 = vector.load %arg9[%c0_186, %c0_187] : memref<8x128xf32, #tpu.memory_space<vmem>>, vector<8x128xf32>
    tpu.vector_store %arg9[%c0_186, %c0_187], %353 {strides = array<i32>} : memref<8x128xf32, #tpu.memory_space<vmem>>, vector<8x128xf32>,
    %c8_i32_188 = arith.constant 8 : i32
    %c0_189 = arith.constant 0 : index
    %c0_190 = arith.constant 0 : index
    %355 = vector.load %arg9[%c0_189, %c0_190] : memref<8x128xf32, #tpu.memory_space<vmem>>, vector<8x128xf32>
    %356 = arith.truncf %355 : vector<8x128xf32> to vector<8x128xbf16>
    %c0_191 = arith.constant 0 : index
    %c0_192 = arith.constant 0 : index
    %357 = vector.load %arg5[%c0_191, %c0_192] : memref<128x128xbf16, #tpu.memory_space<vmem>>, vector<128x128xbf16>
    %cst_193 = arith.constant dense<0.000000e+00> : vector<8x128xf32>
    %358 = tpu.matmul %356, %357, %cst_193 {dimension_numbers = #tpu.dot_dimension_numbers<[1], [0], [0], [1], [0, 0, 1, 1], [], []>} : vector<8x128xbf16>, vector<128x128xbf16>, vector<8x128xf32> -> vector<8x128xf32>
    %c0_194 = arith.constant 0 : index
    %c0_195 = arith.constant 0 : index
    %359 = vector.load %arg6[%c0_194, %c0_195] : memref<1x128xf32, #tpu.memory_space<vmem>>, vector<1x128xf32>
    %360 = vector.broadcast %359 : vector<1x128xf32> to vector<8x128xf32>
    %361 = arith.addf %358, %360 : vector<8x128xf32>
    %c0_196 = arith.constant 0 : index
    %c0_197 = arith.constant 0 : index
    %362 = vector.load %arg7[%c0_196, %c0_197] : memref<8x128xf32, #tpu.memory_space<vmem>>, vector<8x128xf32>
    tpu.vector_store %arg7[%c0_196, %c0_197], %361 {strides = array<i32>} : memref<8x128xf32, #tpu.memory_space<vmem>>, vector<8x128xf32>,
    return
  }
  func.func @transform_0(%arg0: i32) -> (i32, i32) {
    %c0_i32 = arith.constant 0 : i32
    %c0_i32_0 = arith.constant 0 : i32
    %c0_i32_1 = arith.constant 0 : i32
    return %c0_i32, %c0_i32_0 : i32, i32
  }
  func.func @transform_1(%arg0: i32) -> (i32, i32) {
    %c0_i32 = arith.constant 0 : i32
    %c0_i32_0 = arith.constant 0 : i32
    %c0_i32_1 = arith.constant 0 : i32
    return %c0_i32, %c0_i32_0 : i32, i32
  }
  func.func @transform_2(%arg0: i32) -> (i32, i32) {
    %c0_i32 = arith.constant 0 : i32
    %c0_i32_0 = arith.constant 0 : i32
    %c0_i32_1 = arith.constant 0 : i32
    return %c0_i32, %c0_i32_0 : i32, i32
  }
  func.func @transform_3(%arg0: i32) -> (i32, i32) {
    %c0_i32 = arith.constant 0 : i32
    %c0_i32_0 = arith.constant 0 : i32
    %c0_i32_1 = arith.constant 0 : i32
    return %c0_i32, %c0_i32_0 : i32, i32
  }
  func.func @transform_4(%arg0: i32) -> (i32, i32) {
    %c0_i32 = arith.constant 0 : i32
    %c0_i32_0 = arith.constant 0 : i32
    %c0_i32_1 = arith.constant 0 : i32
    return %c0_i32, %c0_i32_0 : i32, i32
  }
  func.func @transform_5(%arg0: i32) -> (i32, i32) {
    %c0_i32 = arith.constant 0 : i32
    %c0_i32_0 = arith.constant 0 : i32
    %c0_i32_1 = arith.constant 0 : i32
    return %c0_i32, %c0_i32_0 : i32, i32
  }
  func.func @transform_6(%arg0: i32) -> (i32, i32) {
    %c0_i32 = arith.constant 0 : i32
    %c0_i32_0 = arith.constant 0 : i32
    %c0_i32_1 = arith.constant 0 : i32
    return %c0_i32, %c0_i32_0 : i32, i32
  }
}

</mosaic_0001>

<bundles_post_ra>
// kernel: tpu_custom_call.1
= control target key start
LH: loop header
LB: loop body
LE: loop exit
PB: predicated region body
PF: predicated region fallthrough
CT: control target
= control target key end

     0   :  { %11 = vsyncpa [#allocation6], 0  ;;  %s4484_s0 = inlined_call_operand.hbm [shape: bf16[64,128], index: 0, kind: input, shape index: {}]   ;;  %s4485_s1 = inlined_call_operand.hbm [shape: bf16[128,512], index: 1, kind: input, shape index: {}]   ;;  %s4486_s2 = inlined_call_operand.hbm [shape: bf16[128,512], index: 2, kind: input, shape index: {}]   ;;  %s4487_s3 = inlined_call_operand.vmem [shape: f32[1,512], index: 3, kind: input, shape index: {}]   ;;  %s4488_s4 = inlined_call_operand.hbm [shape: bf16[128,128], index: 4, kind: input, shape index: {}]   ;;  %s4489_s5 = inlined_call_operand.vmem [shape: f32[1,128], index: 5, kind: input, shape index: {}]   ;;  %s4490_s6 = inlined_call_operand.hbm [shape: f32[8,128], index: 6, kind: output, shape index: {}]  }
   0x1   :  { %12 = vsyncpa [#allocation9], 0 }
   0x2   :  { %13 = vsyncpa [#allocation12], 0 }
   0x3   :  { %14 = vsyncpa [#allocation7], 0  ;;  %s3805_s21 = smov [#allocation8]   ;;  %s3687_s25 = scalar_lea.hbm %s4485_s1, 4096 }
   0x4   :  { %s32_s22 = sshll.u32 %s3805_s21, 4  ;;  %p3688_p0 = scmp.ne.s32.totalorder %s4485_s1, %s3687_s25  ;;  %s33_s22 = int_to_ptr.vmem [resolvable:$true] %s32_s22 }
   0x5   :  { %p3691_p1 = scmp.lt.u32.totalorder %s3687_s25, %s4485_s1 }
   0x7   :  { %p3693_p2 = pnand %p3691_p1, %p3688_p0 }
   0x9   :  { %3696 = shalt.err (!%p3693_p2)
}
   0xa   :  { %s3697_s30 = scalar_lea.vmem %s33_s22, 4096  ;;  %p3702_p4 = scmp.lt.s32.totalorder %s33_s22, %s33_s22 }
   0xb   :  { %p3698_p3 = scmp.ne.s32.totalorder %s33_s22, %s3697_s30  ;;  %p3703_p5 = scmp.lt.s32.totalorder %s3697_s30, %s3697_s30 }
   0xd   :  { %p3704_p6 = por %p3703_p5, %p3702_p4 }
   0xf   :  { %p3705_p7 = pnand %p3704_p6, %p3698_p3 }
  0x11   :  { %3708 = shalt.err (!%p3705_p7)
}
  0x12   :  { %s3806_s7 = smov 256   ;;  %s3807_s8 = smov 16  }
  0x13   :  { %38 = dma.hbm_to_vmem [thread:$0]  %s4485_s1, 4096, %s33_s22, [#allocation9], %s3806_s7, %s3806_s7, %s3807_s8  }
  0x14   :  { %s3808_s11 = smov [#allocation5]   ;;  %s3709_s15 = scalar_lea.hbm %s4484_s0, 512 }
  0x15   :  { %s20_s12 = sshll.u32 %s3808_s11, 4  ;;  %p3710_p8 = scmp.ne.s32.totalorder %s4484_s0, %s3709_s15  ;;  %s21_s12 = int_to_ptr.vmem [resolvable:$true] %s20_s12 }
  0x16   :  { %p3713_p9 = scmp.lt.u32.totalorder %s3709_s15, %s4484_s0 }
  0x18   :  { %p3715_p10 = pnand %p3713_p9, %p3710_p8 }
  0x1a   :  { %3718 = shalt.err (!%p3715_p10)
}
  0x1b   :  { %s3719_s20 = scalar_lea.vmem %s21_s12, 512  ;;  %p3724_p12 = scmp.lt.s32.totalorder %s21_s12, %s21_s12 }
  0x1c   :  { %p3720_p11 = scmp.ne.s32.totalorder %s21_s12, %s3719_s20  ;;  %p3725_p13 = scmp.lt.s32.totalorder %s3719_s20, %s3719_s20 }
  0x1e   :  { %p3726_p0 = por %p3725_p13, %p3724_p12 }
  0x20   :  { %p3727_p1 = pnand %p3726_p0, %p3720_p11 }
  0x22   :  { %3730 = shalt.err (!%p3727_p1)
}
  0x23   :  { %s3809_s1 = smov 64   ;;  %s3810_s21 = smov 4  }
  0x24   :  { %26 = dma.hbm_to_vmem [thread:$0]  %s4484_s0, 512, %s21_s12, [#allocation6], %s3809_s1, %s3809_s1, %s3810_s21  }
  0x25   :  { %s3811_s24 = smov [#allocation10]   ;;  %s3812_s26 = smov [#allocation11]  }
  0x26   :  { %s44_s25 = sshll.u32 %s3811_s24, 4  ;;  %s58_s27 = sshll.u32 %s3812_s26, 4  ;;  %s45_s25 = int_to_ptr.vmem [resolvable:$true] %s44_s25  ;;  %s3883_s27 = int_to_ptr.vmem [resolvable:$true] %s58_s27 }
  0x27   :  { %s3731_s30 = scalar_lea.hbm %s4486_s2, 4096 }
  0x28   :  { %p3732_p2 = scmp.ne.s32.totalorder %s4486_s2, %s3731_s30  ;;  %p3735_p3 = scmp.lt.u32.totalorder %s3731_s30, %s4486_s2 }
  0x2a   :  { %p3737_p4 = pnand %p3735_p3, %p3732_p2 }
  0x2c   :  { %3740 = shalt.err (!%p3737_p4)
}
  0x2d   :  { %s3741_s0 = scalar_lea.vmem %s45_s25, 4096  ;;  %p3746_p6 = scmp.lt.s32.totalorder %s45_s25, %s45_s25 }
  0x2e   :  { %p3742_p5 = scmp.ne.s32.totalorder %s45_s25, %s3741_s0  ;;  %p3747_p7 = scmp.lt.s32.totalorder %s3741_s0, %s3741_s0 }
  0x30   :  { %p3748_p8 = por %p3747_p7, %p3746_p6 }
  0x32   :  { %p3749_p9 = pnand %p3748_p8, %p3742_p5 }
  0x34   :  { %3752 = shalt.err (!%p3749_p9)
}
  0x35   :  { %50 = dma.hbm_to_vmem [thread:$0]  %s4486_s2, 4096, %s45_s25, [#allocation9], %s3806_s7, %s3806_s7, %s3807_s8  }
  0x36   :  { %s3753_s17 = scalar_lea.hbm %s4488_s4, 1024 }
  0x37   :  { %p3754_p10 = scmp.ne.s32.totalorder %s4488_s4, %s3753_s17  ;;  %p3757_p11 = scmp.lt.u32.totalorder %s3753_s17, %s4488_s4 }
  0x39   :  { %p3759_p12 = pnand %p3757_p11, %p3754_p10 }
  0x3b   :  { %3762 = shalt.err (!%p3759_p12)
}
  0x3c   :  { %s3763_s23 = scalar_lea.vmem %s3883_s27, 1024  ;;  %p3768_p0 = scmp.lt.s32.totalorder %s3883_s27, %s3883_s27 }
  0x3d   :  { %p3764_p13 = scmp.ne.s32.totalorder %s3883_s27, %s3763_s23  ;;  %p3769_p1 = scmp.lt.s32.totalorder %s3763_s23, %s3763_s23 }
  0x3f   :  { %p3770_p2 = por %p3769_p1, %p3768_p0 }
  0x41   :  { %p3771_p3 = pnand %p3770_p2, %p3764_p13 }
  0x43   :  { %3774 = shalt.err (!%p3771_p3)
}
  0x44   :  { %64 = dma.hbm_to_vmem [thread:$0]  %s4488_s4, 1024, %s3883_s27, [#allocation12], %s3809_s1, %s3809_s1, %s3810_s21  }
  0x45   :  { %3797 = dma.done.wait [#allocation6], 512  }
  0x46   :  { %3798 = vsyncadd [#allocation6], 4294966784 }
  0x47   :  { %3799 = dma.done.wait [#allocation9], 8192  }
  0x48   :  { %3800 = vsyncadd [#allocation9], 4294959104 }
  0x49   :  { %3801 = dma.done.wait [#allocation12], 1024  }
  0x4a   :  { %3802 = vsyncadd [#allocation12], 4294966272  ;;  %v4491_v0 = vmov 0   ;;  %v3451_v1 = vld [vmem:[#allocation8 + $0x4] ss:$16 sps:$4 sm:$0xff]   ;;  %v3512_v44 = vld [vmem:[#allocation5 + $0x8] sm:$0xff]  }
  0x4b   :  { %358 = vmatprep.mubr.bf16.mxu0 %v4491_v0  ;;  %431 = vmatprep.mubr.bf16.mxu1 %v4491_v0  ;;  %v3453_v2 = vld [vmem:[#allocation8 + $0xc] ss:$16 sps:$4 sm:$0xff]   ;;  %v3455_v3 = vld [vmem:[#allocation8] ss:$16 sps:$4 sm:$0xff]   ;;  %v3456_v4 = vld [vmem:[#allocation8 + $0x8] ss:$16 sps:$4 sm:$0xff]  }
  0x4c   :  { %326 = vmatprep.subr.bf16.mxu0 %v3451_v1  ;;  %399 = vmatprep.subr.bf16.mxu1 %v3453_v2  ;;  %v3457_v5 = vld [vmem:[#allocation8 + $0x24] ss:$16 sps:$4 sm:$0xff]   ;;  %v3459_v6 = vld [vmem:[#allocation8 + $0x2c] ss:$16 sps:$4 sm:$0xff]   ;;  %v3461_v7 = vld [vmem:[#allocation8 + $0x20] ss:$16 sps:$4 sm:$0xff]  }
  0x4d   :  { %327 = vmatpush1.bf16.msra.mxu0 %v3455_v3  ;;  %400 = vmatpush1.bf16.msra.mxu1 %v3456_v4  ;;  %v3462_v8 = vld [vmem:[#allocation8 + $0x28] ss:$16 sps:$4 sm:$0xff]   ;;  %v3463_v9 = vld [vmem:[#allocation8 + $0x44] ss:$16 sps:$4 sm:$0xff]   ;;  %v3465_v10 = vld [vmem:[#allocation8 + $0x4c] ss:$16 sps:$4 sm:$0xff]  }
  0x4e   :  { %328 = vmatprep.subr.bf16.mxu0 %v3457_v5  ;;  %401 = vmatprep.subr.bf16.mxu1 %v3459_v6  ;;  %v3467_v11 = vld [vmem:[#allocation8 + $0x40] ss:$16 sps:$4 sm:$0xff]   ;;  %v3468_v12 = vld [vmem:[#allocation8 + $0x48] ss:$16 sps:$4 sm:$0xff]   ;;  %v3469_v13 = vld [vmem:[#allocation8 + $0x64] ss:$16 sps:$4 sm:$0xff]  }
  0x4f   :  { %v3471_v14 = vld [vmem:[#allocation8 + $0x6c] ss:$16 sps:$4 sm:$0xff]   ;;  %v3473_v15 = vld [vmem:[#allocation8 + $0x60] ss:$16 sps:$4 sm:$0xff]   ;;  %v3474_v16 = vld [vmem:[#allocation8 + $0x68] ss:$16 sps:$4 sm:$0xff]  }
  0x50   :  { %v3475_v17 = vld [vmem:[#allocation8 + $0x84] ss:$16 sps:$4 sm:$0xff]   ;;  %v3477_v18 = vld [vmem:[#allocation8 + $0x8c] ss:$16 sps:$4 sm:$0xff]   ;;  %v3479_v19 = vld [vmem:[#allocation8 + $0x80] ss:$16 sps:$4 sm:$0xff]  }
  0x51   :  { %329 = vmatpush1.bf16.msra.mxu0 %v3461_v7  ;;  %402 = vmatpush1.bf16.msra.mxu1 %v3462_v8  ;;  %v3480_v20 = vld [vmem:[#allocation8 + $0x88] ss:$16 sps:$4 sm:$0xff]   ;;  %v3481_v21 = vld [vmem:[#allocation8 + $0xa4] ss:$16 sps:$4 sm:$0xff]   ;;  %v3483_v22 = vld [vmem:[#allocation8 + $0xac] ss:$16 sps:$4 sm:$0xff]   ;;  %v122_v7 = vlaneseq }
  0x52   :  { %330 = vmatprep.subr.bf16.mxu0 %v3463_v9  ;;  %403 = vmatprep.subr.bf16.mxu1 %v3465_v10  ;;  %v3485_v23 = vld [vmem:[#allocation8 + $0xa0] ss:$16 sps:$4 sm:$0xff]   ;;  %v3486_v24 = vld [vmem:[#allocation8 + $0xa8] ss:$16 sps:$4 sm:$0xff]   ;;  %v3487_v25 = vld [vmem:[#allocation8 + $0xc4] ss:$16 sps:$4 sm:$0xff]  }
  0x53   :  { %v3489_v26 = vld [vmem:[#allocation8 + $0xcc] ss:$16 sps:$4 sm:$0xff]   ;;  %v3491_v27 = vld [vmem:[#allocation8 + $0xc0] ss:$16 sps:$4 sm:$0xff]   ;;  %v3492_v28 = vld [vmem:[#allocation8 + $0xc8] ss:$16 sps:$4 sm:$0xff]  }
  0x54   :  { %v3493_v29 = vld [vmem:[#allocation8 + $0xe4] ss:$16 sps:$4 sm:$0xff]   ;;  %v3495_v30 = vld [vmem:[#allocation8 + $0xec] ss:$16 sps:$4 sm:$0xff]   ;;  %v3497_v31 = vld [vmem:[#allocation8 + $0xe0] ss:$16 sps:$4 sm:$0xff]  }
  0x55   :  { %331 = vmatpush1.bf16.msra.mxu0 %v3467_v11  ;;  %404 = vmatpush1.bf16.msra.mxu1 %v3468_v12  ;;  %v3498_v32 = vld [vmem:[#allocation8 + $0xe8] ss:$16 sps:$4 sm:$0xff]   ;;  %v3922_v33 = vld [vmem:[#allocation10 + $0x4] ss:$16 sps:$4 sm:$0xff]   ;;  %v3924_v34 = vld [vmem:[#allocation10 + $0xc] ss:$16 sps:$4 sm:$0xff]  }
  0x56   :  { %332 = vmatprep.subr.bf16.mxu0 %v3469_v13  ;;  %405 = vmatprep.subr.bf16.mxu1 %v3471_v14  ;;  %v3499_v35 = vld [vmem:[#allocation5] sm:$0xff]   ;;  %v3928_v37 = vld [vmem:[#allocation10 + $0x8] ss:$16 sps:$4 sm:$0xff]   ;;  %v3934_v39 = vld [vmem:[#allocation10 + $0x2c] ss:$16 sps:$4 sm:$0xff]   ;;  %v3814_v6 = vmov 0.0|0.0  }
  0x57   :  { %v3926_v36 = vld [vmem:[#allocation10] ss:$16 sps:$4 sm:$0xff]   ;;  %v3932_v38 = vld [vmem:[#allocation10 + $0x24] ss:$16 sps:$4 sm:$0xff]   ;;  %v3940_v41 = vld [vmem:[#allocation10 + $0x28] ss:$16 sps:$4 sm:$0xff]  }
  0x58   :  { %v3936_v40 = vld [vmem:[#allocation10 + $0x20] ss:$16 sps:$4 sm:$0xff]   ;;  %v3944_v42 = vld [vmem:[#allocation10 + $0x44] ss:$16 sps:$4 sm:$0xff]   ;;  %v3946_v43 = vld [vmem:[#allocation10 + $0x4c] ss:$16 sps:$4 sm:$0xff]  }
  0x59   :  { %333 = vmatpush1.bf16.msra.mxu0 %v3473_v15  ;;  %406 = vmatpush1.bf16.msra.mxu1 %v3474_v16  ;;  %v3950_v45 = vld [vmem:[#allocation10 + $0x40] ss:$16 sps:$4 sm:$0xff]   ;;  %v3952_v46 = vld [vmem:[#allocation10 + $0x48] ss:$16 sps:$4 sm:$0xff]   ;;  %v3956_v47 = vld [vmem:[#allocation10 + $0x64] ss:$16 sps:$4 sm:$0xff]  }
  0x5a   :  { %334 = vmatprep.subr.bf16.mxu0 %v3475_v17  ;;  %407 = vmatprep.subr.bf16.mxu1 %v3477_v18  ;;  %v3960_v48 = vld [vmem:[#allocation10 + $0x6c] ss:$16 sps:$4 sm:$0xff]   ;;  %v3962_v49 = vld [vmem:[#allocation10 + $0x60] ss:$16 sps:$4 sm:$0xff]   ;;  %v3964_v50 = vld [vmem:[#allocation10 + $0x68] ss:$16 sps:$4 sm:$0xff]  }
  0x5b   :  { %v3968_v51 = vld [vmem:[#allocation10 + $0x84] ss:$16 sps:$4 sm:$0xff]   ;;  %v3972_v52 = vld [vmem:[#allocation10 + $0x8c] ss:$16 sps:$4 sm:$0xff]   ;;  %v3976_v54 = vld [vmem:[#allocation10 + $0x80] ss:$16 sps:$4 sm:$0xff]  }
  0x5c   :  { %v3525_v53 = vld [vmem:[#allocation5 + $0x10] sm:$0xff]   ;;  %v3978_v55 = vld [vmem:[#allocation10 + $0x88] ss:$16 sps:$4 sm:$0xff]   ;;  %v3982_v57 = vld [vmem:[#allocation10 + $0xac] ss:$16 sps:$4 sm:$0xff]   ;;  %v123_v8 = vshrl.u32 %v122_v7, 7 }
  0x5d   :  { %335 = vmatpush1.bf16.msra.mxu0 %v3479_v19  ;;  %408 = vmatpush1.bf16.msra.mxu1 %v3480_v20  ;;  %v3980_v56 = vld [vmem:[#allocation10 + $0xa4] ss:$16 sps:$4 sm:$0xff]   ;;  %v3988_v58 = vld [vmem:[#allocation10 + $0xa0] ss:$16 sps:$4 sm:$0xff]   ;;  %v3990_v59 = vld [vmem:[#allocation10 + $0xa8] ss:$16 sps:$4 sm:$0xff]  }
  0x5e   :  { %336 = vmatprep.subr.bf16.mxu0 %v3481_v21  ;;  %409 = vmatprep.subr.bf16.mxu1 %v3483_v22  ;;  %v3992_v60 = vld [vmem:[#allocation10 + $0xc4] ss:$16 sps:$4 sm:$0xff]   ;;  %v3994_v61 = vld [vmem:[#allocation10 + $0xcc] ss:$16 sps:$4 sm:$0xff]   ;;  %v4002_v63 = vld [vmem:[#allocation10 + $0xc0] ss:$16 sps:$4 sm:$0xff]  }
  0x5f   :  { %v3538_v62 = vld [vmem:[#allocation5 + $0x18] sm:$0xff]   ;;  %v4006_v2 = vld [vmem:[#allocation10 + $0xe4] ss:$16 sps:$4 sm:$0xff]   ;;  %v4014_v4 = vld [vmem:[#allocation10 + $0xe0] ss:$16 sps:$4 sm:$0xff]   ;;  %v132_v9 = vsub.s32 2, %v123_v8 }
  0x60   :  { %v4004_v1 = vld [vmem:[#allocation10 + $0xc8] ss:$16 sps:$4 sm:$0xff]   ;;  %v4008_v3 = vld [vmem:[#allocation10 + $0xec] ss:$16 sps:$4 sm:$0xff]   ;;  %v136_v10 = vsub.s32 3, %v123_v8  ;;  %v124_v11 = vsub.s32 0, %v123_v8 }
  0x61   :  { %337 = vmatpush1.bf16.msra.mxu0 %v3485_v23  ;;  %410 = vmatpush1.bf16.msra.mxu1 %v3486_v24  ;;  %v4016_v5 = vld [vmem:[#allocation10 + $0xe8] ss:$16 sps:$4 sm:$0xff]   ;;  %v120_v12 = vld [vmem:[%s4487_s3] sm:$0xf]  ;;  %v128_v13 = vsub.s32 1, %v123_v8  ;;  %vm3816_vm0 = vmmov 0  }
  0x62   :  { %338 = vmatprep.subr.bf16.mxu0 %v3487_v25  ;;  %411 = vmatprep.subr.bf16.mxu1 %v3489_v26  ;;  %v4065_v14 = vrot.slane %v120_v12, %v132_v9  ;;  %v4071_v17 = vrot.slane %v120_v12, %v136_v10  ;;  %v125_v18 = vrot.slane %v120_v12, %v124_v11  ;;  %s3817_s21 = smov [#allocation13]  }
  0x63   :  { %v129_v21 = vrot.slane %v120_v12, %v128_v13  ;;  %s3090_s24 = sshll.u32 %s3817_s21, 4  ;;  %s3091_s24 = int_to_ptr.vmem [resolvable:$true] %s3090_s24 }
  0x64   :  { %s3775_s25 = scalar_lea.vmem %s3091_s24, 128  ;;  %p3780_p5 = scmp.lt.s32.totalorder %s3091_s24, %s3091_s24 }
  0x65   :  { %339 = vmatpush1.bf16.msra.mxu0 %v3491_v27  ;;  %412 = vmatpush1.bf16.msra.mxu1 %v3492_v28  ;;  %p3776_p4 = scmp.ne.s32.totalorder %s3091_s24, %s3775_s25  ;;  %p3781_p6 = scmp.lt.s32.totalorder %s3775_s25, %s3775_s25 }
  0x66   :  { %340 = vmatprep.subr.bf16.mxu0 %v3493_v29  ;;  %413 = vmatprep.subr.bf16.mxu1 %v3495_v30 }
  0x67   :  { %p3782_p7 = por %p3781_p6, %p3780_p5 }
  0x69   :  { %341 = vmatpush1.bf16.msra.mxu0 %v3497_v31  ;;  %414 = vmatpush1.bf16.msra.mxu1 %v3498_v32  ;;  %p3783_p8 = pnand %p3782_p7, %p3776_p4 }
  0x6a   :  { %707 = vmatprep.subr.bf16.mxu0 %v3922_v33  ;;  %748 = vmatprep.subr.bf16.mxu1 %v3924_v34 }
  0x6c   :  { %359 = vmatmul.mubr.bf16.vlgmr.msra.gmra.mrb[0].mxu0 %v3499_v35  ;;  %432 = vmatmul.mubr.bf16.vlgmr.msra.gmra.mrb[0].mxu1 %v3499_v35 }
  0x6d   :  { %708 = vmatpush1.bf16.msra.mxu0 %v3926_v36  ;;  %749 = vmatpush1.bf16.msra.mxu1 %v3928_v37 }
  0x6e   :  { %709 = vmatprep.subr.bf16.mxu0 %v3932_v38  ;;  %750 = vmatprep.subr.bf16.mxu1 %v3934_v39 }
  0x6f   :  { %368 = vmatprep.mubr.bf16.mxu0 %v4491_v0  ;;  %441 = vmatprep.mubr.bf16.mxu1 %v4491_v0 }
  0x71   :  { %710 = vmatpush1.bf16.msra.mxu0 %v3936_v40  ;;  %751 = vmatpush1.bf16.msra.mxu1 %v3940_v41 }
  0x72   :  { %711 = vmatprep.subr.bf16.mxu0 %v3944_v42  ;;  %752 = vmatprep.subr.bf16.mxu1 %v3946_v43 }
  0x74   :  { %369 = vmatmul.mubr.bf16.gmra.mrb[4].mxu0 %v3512_v44  ;;  %442 = vmatmul.mubr.bf16.gmra.mrb[4].mxu1 %v3512_v44 }
  0x75   :  { %712 = vmatpush1.bf16.msra.mxu0 %v3950_v45  ;;  %753 = vmatpush1.bf16.msra.mxu1 %v3952_v46 }
  0x76   :  { %713 = vmatprep.subr.bf16.mxu0 %v3956_v47  ;;  %754 = vmatprep.subr.bf16.mxu1 %v3960_v48 }
  0x77   :  { %378 = vmatprep.mubr.bf16.mxu0 %v4491_v0  ;;  %451 = vmatprep.mubr.bf16.mxu1 %v4491_v0 }
  0x79   :  { %714 = vmatpush1.bf16.msra.mxu0 %v3962_v49  ;;  %755 = vmatpush1.bf16.msra.mxu1 %v3964_v50 }
  0x7a   :  { %715 = vmatprep.subr.bf16.mxu0 %v3968_v51  ;;  %756 = vmatprep.subr.bf16.mxu1 %v3972_v52 }
  0x7c   :  { %379 = vmatmul.mubr.bf16.gmra.mrb[8].mxu0 %v3525_v53  ;;  %452 = vmatmul.mubr.bf16.gmra.mrb[8].mxu1 %v3525_v53 }
  0x7d   :  { %716 = vmatpush1.bf16.msra.mxu0 %v3976_v54  ;;  %757 = vmatpush1.bf16.msra.mxu1 %v3978_v55 }
  0x7e   :  { %717 = vmatprep.subr.bf16.mxu0 %v3980_v56  ;;  %758 = vmatprep.subr.bf16.mxu1 %v3982_v57 }
  0x7f   :  { %388 = vmatprep.mubr.bf16.mxu0 %v4491_v0  ;;  %461 = vmatprep.mubr.bf16.mxu1 %v4491_v0 }
  0x81   :  { %718 = vmatpush1.bf16.msra.mxu0 %v3988_v58  ;;  %759 = vmatpush1.bf16.msra.mxu1 %v3990_v59 }
  0x82   :  { %719 = vmatprep.subr.bf16.mxu0 %v3992_v60  ;;  %760 = vmatprep.subr.bf16.mxu1 %v3994_v61 }
  0x84   :  { %389 = vmatmul.mubr.bf16.gmra.mrb[12].mxu0 %v3538_v62  ;;  %462 = vmatmul.mubr.bf16.gmra.mrb[12].mxu1 %v3538_v62 }
  0x85   :  { %720 = vmatpush1.bf16.msra.mxu0 %v4002_v63  ;;  %761 = vmatpush1.bf16.msra.mxu1 %v4004_v1 }
  0x86   :  { %721 = vmatprep.subr.bf16.mxu0 %v4006_v2  ;;  %762 = vmatprep.subr.bf16.mxu1 %v4008_v3 }
  0x87   :  { %739 = vmatprep.mubr.bf16.mxu0 %v4491_v0  ;;  %780 = vmatprep.mubr.bf16.mxu1 %v4491_v0 }
  0x89   :  { %722 = vmatpush1.bf16.msra.mxu0 %v4014_v4  ;;  %763 = vmatpush1.bf16.msra.mxu1 %v4016_v5 }
  0x8a   :  { %1015 = vmatprep.subr.bf16.mxu0 %v3922_v33  ;;  %1056 = vmatprep.subr.bf16.mxu1 %v3924_v34 }
  0x8c   :  { %740 = vmatmul.mubr.bf16.vlgmr.msra.gmra.mrb[16].mxu0 %v3814_v6  ;;  %781 = vmatmul.mubr.bf16.vlgmr.msra.gmra.mrb[16].mxu1 %v3814_v6 }
  0x8d   :  { %1016 = vmatpush1.bf16.msra.mxu0 %v3926_v36  ;;  %1057 = vmatpush1.bf16.msra.mxu1 %v3928_v37 }
  0x8e   :  { %1017 = vmatprep.subr.bf16.mxu0 %v3932_v38  ;;  %1058 = vmatprep.subr.bf16.mxu1 %v3934_v39 }
  0x8f   :  { %1047 = vmatprep.mubr.bf16.mxu0 %v4491_v0  ;;  %1088 = vmatprep.mubr.bf16.mxu1 %v4491_v0 }
  0x91   :  { %1018 = vmatpush1.bf16.msra.mxu0 %v3936_v40  ;;  %1059 = vmatpush1.bf16.msra.mxu1 %v3940_v41 }
  0x92   :  { %1019 = vmatprep.subr.bf16.mxu0 %v3944_v42  ;;  %1060 = vmatprep.subr.bf16.mxu1 %v3946_v43 }
  0x95   :  { %1020 = vmatpush1.bf16.msra.mxu0 %v3950_v45  ;;  %1061 = vmatpush1.bf16.msra.mxu1 %v3952_v46 }
  0x96   :  { %1021 = vmatprep.subr.bf16.mxu0 %v3956_v47  ;;  %1062 = vmatprep.subr.bf16.mxu1 %v3960_v48 }
  0x99   :  { %1022 = vmatpush1.bf16.msra.mxu0 %v3962_v49  ;;  %1063 = vmatpush1.bf16.msra.mxu1 %v3964_v50 }
  0x9a   :  { %1023 = vmatprep.subr.bf16.mxu0 %v3968_v51  ;;  %1064 = vmatprep.subr.bf16.mxu1 %v3972_v52 }
  0x9d   :  { %1024 = vmatpush1.bf16.msra.mxu0 %v3976_v54  ;;  %1065 = vmatpush1.bf16.msra.mxu1 %v3978_v55 }
  0x9e   :  { %1025 = vmatprep.subr.bf16.mxu0 %v3980_v56  ;;  %1066 = vmatprep.subr.bf16.mxu1 %v3982_v57 }
  0xa1   :  { %1026 = vmatpush1.bf16.msra.mxu0 %v3988_v58  ;;  %1067 = vmatpush1.bf16.msra.mxu1 %v3990_v59 }
  0xa2   :  { %1027 = vmatprep.subr.bf16.mxu0 %v3992_v60  ;;  %1068 = vmatprep.subr.bf16.mxu1 %v3994_v61 }
  0xa5   :  { %1028 = vmatpush1.bf16.msra.mxu0 %v4002_v63  ;;  %1069 = vmatpush1.bf16.msra.mxu1 %v4004_v1 }
  0xa6   :  { %1029 = vmatprep.subr.bf16.mxu0 %v4006_v2  ;;  %1070 = vmatprep.subr.bf16.mxu1 %v4008_v3 }
  0xa9   :  { %1030 = vmatpush1.bf16.msra.mxu0 %v4014_v4  ;;  %1071 = vmatpush1.bf16.msra.mxu1 %v4016_v5 }
  0xaa   :  { %1323 = vmatprep.subr.bf16.mxu0 %v3922_v33  ;;  %1364 = vmatprep.subr.bf16.mxu1 %v3924_v34 }
 0x13f   :  { %v4067_v15 = vpop.f32.mrb[0].mxu0  ;;  %v4069_v16 = vpop.f32.mrb[0].mxu1 }
 0x140   :  { %v362_v19 = vpop.f32.mrb[1].mxu0  ;;  %v435_v20 = vpop.f32.mrb[1].mxu1 }
 0x141   :  { %v364_v22 = vpop.f32.mrb[2].mxu0  ;;  %v437_v23 = vpop.f32.mrb[2].mxu1 }
 0x142   :  { %v4073_v24 = vadd.f32 %v364_v22, %v125_v18  ;;  %v366_v25 = vpop.f32.mrb[3].mxu0  ;;  %v4076_v26 = vadd.f32 %v437_v23, %v4065_v14  ;;  %v439_v27 = vpop.f32.mrb[3].mxu1 }
 0x143   :  { %v4078_v28 = vadd.f32 %v366_v25, %v129_v21  ;;  %v4081_v29 = vadd.f32 %v439_v27, %v4071_v17 }
 0x147   :  { %v370_v30 = vpop.f32.mrb[4].mxu0  ;;  %v443_v31 = vpop.f32.mrb[4].mxu1 }
 0x148   :  { %v4083_v32 = vadd.f32 %v370_v30, %v125_v18  ;;  %v372_v35 = vpop.f32.mrb[5].mxu0  ;;  %v4086_v44 = vadd.f32 %v443_v31, %v4065_v14  ;;  %v445_v53 = vpop.f32.mrb[5].mxu1 }
 0x149   :  { %v4088_v62 = vadd.f32 %v372_v35, %v129_v21  ;;  %v374_v6 = vpop.f32.mrb[6].mxu0  ;;  %v4091_v7 = vadd.f32 %v445_v53, %v4071_v17  ;;  %v447_v8 = vpop.f32.mrb[6].mxu1 }
 0x14a   :  { %v4093_v9 = vadd.f32 %v374_v6, %v125_v18  ;;  %v376_v10 = vpop.f32.mrb[7].mxu0  ;;  %v4096_v11 = vadd.f32 %v447_v8, %v4065_v14  ;;  %v449_v12 = vpop.f32.mrb[7].mxu1 }
 0x14b   :  { %4493 = vst [vmem:[#allocation18_spill] sm:$0xff] %v4091_v7  ;;  %v4098_v13 = vadd.f32 %v376_v10, %v129_v21  ;;  %v4101_v22 = vadd.f32 %v449_v12, %v4071_v17 }
 0x14c   :  { %4494 = vst [vmem:[#allocation19_spill] sm:$0xff] %v4093_v9  ;;  %4495 = vst [vmem:[#allocation20_spill] sm:$0xff] %v4096_v11 }
 0x14d   :  { %4496 = vst [vmem:[#allocation21_spill] sm:$0xff] %v4098_v13  ;;  %4497 = vst [vmem:[#allocation22_spill] sm:$0xff] %v4101_v22 }
 0x14f   :  { %v380_v23 = vpop.f32.mrb[8].mxu0  ;;  %v453_v25 = vpop.f32.mrb[8].mxu1 }
 0x150   :  { %v4103_v27 = vadd.f32 %v380_v23, %v125_v18  ;;  %v382_v30 = vpop.f32.mrb[9].mxu0  ;;  %v4106_v31 = vadd.f32 %v453_v25, %v4065_v14  ;;  %v455_v35 = vpop.f32.mrb[9].mxu1 }
 0x151   :  { %v4108_v53 = vadd.f32 %v382_v30, %v129_v21  ;;  %v384_v6 = vpop.f32.mrb[10].mxu0  ;;  %v4111_v8 = vadd.f32 %v455_v35, %v4071_v17  ;;  %v457_v10 = vpop.f32.mrb[10].mxu1 }
 0x152   :  { %4498 = vst [vmem:[#allocation23_spill] sm:$0xff] %v4103_v27  ;;  %4499 = vst [vmem:[#allocation24_spill] sm:$0xff] %v4106_v31  ;;  %v4113_v0 = vadd.f32 %v384_v6, %v125_v18  ;;  %v386_v12 = vpop.f32.mrb[11].mxu0  ;;  %v4116_v22 = vadd.f32 %v457_v10, %v4065_v14  ;;  %v459_v23 = vpop.f32.mrb[11].mxu1 }
 0x153   :  { %4500 = vst [vmem:[#allocation25_spill] sm:$0xff] %v4108_v53  ;;  %4501 = vst [vmem:[#allocation26_spill] sm:$0xff] %v4111_v8  ;;  %v4118_v27 = vadd.f32 %v386_v12, %v129_v21  ;;  %v4121_v25 = vadd.f32 %v459_v23, %v4071_v17 }
 0x154   :  { %4502 = vst [vmem:[#allocation27_spill] sm:$0xff] %v4113_v0  ;;  %4503 = vst [vmem:[#allocation28_spill] sm:$0xff] %v4116_v22 }
 0x155   :  { %4504 = vst [vmem:[#allocation29_spill] sm:$0xff] %v4118_v27  ;;  %4505 = vst [vmem:[#allocation30_spill] sm:$0xff] %v4121_v25 }
 0x157   :  { %v390_v31 = vpop.f32.mrb[12].mxu0  ;;  %v463_v30 = vpop.f32.mrb[12].mxu1 }
 0x158   :  { %v4123_v53 = vadd.f32 %v390_v31, %v125_v18  ;;  %v392_v13 = vpop.f32.mrb[13].mxu0  ;;  %v4126_v35 = vadd.f32 %v463_v30, %v4065_v14  ;;  %v465_v6 = vpop.f32.mrb[13].mxu1 }
 0x159   :  { %v4128_v0 = vadd.f32 %v392_v13, %v129_v21  ;;  %v394_v8 = vpop.f32.mrb[14].mxu0  ;;  %v4131_v10 = vadd.f32 %v465_v6, %v4071_v17  ;;  %v467_v12 = vpop.f32.mrb[14].mxu1  ;;  %v361_v13 = vadd.f32 %v4067_v15, %v125_v18  ;;  %v363_v6 = vadd.f32 %v362_v19, %v129_v21 }
 0x15a   :  { %4506 = vst [vmem:[#allocation31_spill] sm:$0xff] %v4123_v53  ;;  %4507 = vst [vmem:[#allocation32_spill] sm:$0xff] %v4126_v35  ;;  %v4133_v27 = vadd.f32 %v394_v8, %v125_v18  ;;  %v396_v23 = vpop.f32.mrb[15].mxu0  ;;  %v4136_v25 = vadd.f32 %v467_v12, %v4065_v14  ;;  %v469_v31 = vpop.f32.mrb[15].mxu1 }
 0x15b   :  { %4508 = vst [vmem:[#allocation33_spill] sm:$0xff] %v4128_v0  ;;  %4509 = vst [vmem:[#allocation34_spill] sm:$0xff] %v4131_v10  ;;  %v4138_v53 = vadd.f32 %v396_v23, %v129_v21  ;;  %v4141_v30 = vadd.f32 %v469_v31, %v4071_v17  ;;  %v434_v0 = vadd.f32 %v4069_v16, %v4065_v14 }
 0x15c   :  { %4510 = vst [vmem:[#allocation35_spill] sm:$0xff] %v4133_v27  ;;  %4511 = vst [vmem:[#allocation36_spill] sm:$0xff] %v4136_v25  ;;  %v436_v10 = vadd.f32 %v435_v20, %v4071_v17 }
 0x15d   :  { %4512 = vst [vmem:[#allocation37_spill] sm:$0xff] %v4138_v53  ;;  %4513 = vst [vmem:[#allocation38_spill] sm:$0xff] %v4141_v30 }
 0x15f   :  { %v741_v8 = vpop.f32.mrb[16].mxu0  ;;  %v782_v27 = vpop.f32.mrb[16].mxu1 }
 0x160   :  { %v789_v35 = vadd.f32 %v741_v8, %v361_v13  ;;  %v791_v22 = vadd.f32 %v782_v27, %v434_v0  ;;  %v743_v12 = vpop.f32.mrb[17].mxu0  ;;  %v784_v25 = vpop.f32.mrb[17].mxu1 }
 0x161   :  { %v790_v11 = vadd.f32 %v743_v12, %v363_v6  ;;  %v792_v23 = vadd.f32 %v784_v25, %v436_v10  ;;  %v745_v53 = vpop.f32.mrb[18].mxu0  ;;  %v786_v9 = vpop.f32.mrb[18].mxu1 }
 0x162   :  { %v793_v31 = vmul.f32 0.5, %v789_v35  ;;  %v746_v30 = vpop.f32.mrb[19].mxu0  ;;  %v787_v7 = vpop.f32.mrb[19].mxu1 }
 0x163   :  { %v797_v15 = vmul.f32 0.5, %v790_v11  ;;  %v802_v14 = vmul.f32 0.5, %v792_v23  ;;  %v4514_v30 = vmov 0  }
 0x164   :  { %3607 = vtanh.f32 %v793_v31 }
 0x165   :  { %3609 = vtanh.f32 %v797_v15 }
 0x166   :  { %3611 = vtanh.f32 %v791_v22 }
 0x167   :  { %3613 = vtanh.f32 %v802_v14 }
 0x16e   :  { %v3608_v16 = vpop.eup %3607 }
 0x16f   :  { %v3610_v17 = vpop.eup %3609  ;;  %v795_v18 = vmul.f32 0.5, %v3608_v16 }
 0x170   :  { %v799_v19 = vmul.f32 0.5, %v3610_v17  ;;  %v3612_v20 = vpop.eup %3611 }
 0x171   :  { %v796_v0 = vadd.f32 0.5, %v795_v18  ;;  %v3614_v7 = vpop.eup %3613 }
 0x172   :  { %v800_v21 = vadd.f32 0.5, %v799_v19  ;;  %v804_v9 = vmul.f32 0.5, %v3614_v7 }
 0x173   :  { %v808_v27 = vmul.f32 %v3612_v20, %v796_v0 }
 0x174   :  { %v807_v25 = vmul.f32 0.0, %v800_v21  ;;  %v805_v11 = vadd.f32 0.5, %v804_v9 }
 0x176   :  { %v4147_v53 = vadd.f32 %v808_v27, %v807_v25 }
 0x178   :  { %3615 = vtanh.f32 %v4147_v53 }
 0x182   :  { %v3616_v35 = vpop.eup %3615 }
 0x183   :  { %v812_v22 = vmul.f32 %v3616_v35, %v805_v11 }
 0x185   :  { %v822_v10 = vpack.c.bf16 %v812_v22, %v812_v22 }
 0x187   :  { %1048 = vmatmul.mubr.bf16.vlgmr.msra.gmra.mrb[20].mxu0 %v822_v10  ;;  %1089 = vmatmul.mubr.bf16.vlgmr.msra.gmra.mrb[20].mxu1 %v822_v10 }
 0x188   :  { %1324 = vmatpush1.bf16.msra.mxu0 %v3926_v36  ;;  %1365 = vmatpush1.bf16.msra.mxu1 %v3928_v37 }
 0x189   :  { %1325 = vmatprep.subr.bf16.mxu0 %v3932_v38  ;;  %1366 = vmatprep.subr.bf16.mxu1 %v3934_v39 }
 0x18a   :  { %1355 = vmatprep.mubr.bf16.mxu0 %v4514_v30  ;;  %1396 = vmatprep.mubr.bf16.mxu1 %v4514_v30 }
 0x18c   :  { %1326 = vmatpush1.bf16.msra.mxu0 %v3936_v40  ;;  %1367 = vmatpush1.bf16.msra.mxu1 %v3940_v41 }
 0x18d   :  { %1327 = vmatprep.subr.bf16.mxu0 %v3944_v42  ;;  %1368 = vmatprep.subr.bf16.mxu1 %v3946_v43 }
 0x190   :  { %1328 = vmatpush1.bf16.msra.mxu0 %v3950_v45  ;;  %1369 = vmatpush1.bf16.msra.mxu1 %v3952_v46 }
 0x191   :  { %1329 = vmatprep.subr.bf16.mxu0 %v3956_v47  ;;  %1370 = vmatprep.subr.bf16.mxu1 %v3960_v48 }
 0x194   :  { %1330 = vmatpush1.bf16.msra.mxu0 %v3962_v49  ;;  %1371 = vmatpush1.bf16.msra.mxu1 %v3964_v50 }
 0x195   :  { %1331 = vmatprep.subr.bf16.mxu0 %v3968_v51  ;;  %1372 = vmatprep.subr.bf16.mxu1 %v3972_v52 }
 0x198   :  { %1332 = vmatpush1.bf16.msra.mxu0 %v3976_v54  ;;  %1373 = vmatpush1.bf16.msra.mxu1 %v3978_v55 }
 0x199   :  { %1333 = vmatprep.subr.bf16.mxu0 %v3980_v56  ;;  %1374 = vmatprep.subr.bf16.mxu1 %v3982_v57 }
 0x19c   :  { %1334 = vmatpush1.bf16.msra.mxu0 %v3988_v58  ;;  %1375 = vmatpush1.bf16.msra.mxu1 %v3990_v59 }
 0x19d   :  { %1335 = vmatprep.subr.bf16.mxu0 %v3992_v60  ;;  %1376 = vmatprep.subr.bf16.mxu1 %v3994_v61 }
 0x1a0   :  { %1336 = vmatpush1.bf16.msra.mxu0 %v4002_v63  ;;  %1377 = vmatpush1.bf16.msra.mxu1 %v4004_v1 }
 0x1a1   :  { %1337 = vmatprep.subr.bf16.mxu0 %v4006_v2  ;;  %1378 = vmatprep.subr.bf16.mxu1 %v4008_v3 }
 0x1a4   :  { %1338 = vmatpush1.bf16.msra.mxu0 %v4014_v4  ;;  %1379 = vmatpush1.bf16.msra.mxu1 %v4016_v5 }
 0x1a5   :  { %1631 = vmatprep.subr.bf16.mxu0 %v3922_v33  ;;  %1672 = vmatprep.subr.bf16.mxu1 %v3924_v34 }
 0x25a   :  { %v1049_v13 = vpop.f32.mrb[20].mxu0  ;;  %v1090_v6 = vpop.f32.mrb[20].mxu1 }
 0x25b   :  { %v1097_v8 = vadd.f32 %v1049_v13, %v4073_v24  ;;  %v1099_v12 = vadd.f32 %v1090_v6, %v4076_v26  ;;  %v1051_v23 = vpop.f32.mrb[21].mxu0  ;;  %v1092_v31 = vpop.f32.mrb[21].mxu1 }
 0x25c   :  { %v1098_v15 = vadd.f32 %v1051_v23, %v4078_v28  ;;  %v1100_v14 = vadd.f32 %v1092_v31, %v4081_v29  ;;  %v1053_v16 = vpop.f32.mrb[22].mxu0  ;;  %v1094_v17 = vpop.f32.mrb[22].mxu1  ;;  %v4246_v23 = vld [vmem:[#allocation10 + $0x24] ss:$16 sps:$4 sm:$0xff]   ;;  %v4248_v31 = vld [vmem:[#allocation10 + $0x2c] ss:$16 sps:$4 sm:$0xff]  }
 0x25d   :  { %v1101_v18 = vmul.f32 0.5, %v1097_v8  ;;  %v1054_v19 = vpop.f32.mrb[23].mxu0  ;;  %v1095_v0 = vpop.f32.mrb[23].mxu1  ;;  %v4238_v8 = vld [vmem:[#allocation10] ss:$16 sps:$4 sm:$0xff]  }
 0x25e   :  { %v1105_v33 = vmul.f32 0.5, %v1098_v15  ;;  %v1110_v34 = vmul.f32 0.5, %v1100_v14  ;;  %v4250_v15 = vld [vmem:[#allocation10 + $0x20] ss:$16 sps:$4 sm:$0xff]   ;;  %v4252_v14 = vld [vmem:[#allocation10 + $0x28] ss:$16 sps:$4 sm:$0xff]  }
 0x25f   :  { %3617 = vtanh.f32 %v1101_v18  ;;  %v4258_v16 = vld [vmem:[#allocation10 + $0x44] ss:$16 sps:$4 sm:$0xff]   ;;  %v4260_v17 = vld [vmem:[#allocation10 + $0x4c] ss:$16 sps:$4 sm:$0xff]   ;;  %v4262_v18 = vld [vmem:[#allocation10 + $0x40] ss:$16 sps:$4 sm:$0xff]  }
 0x260   :  { %3619 = vtanh.f32 %v1105_v33  ;;  %v4264_v19 = vld [vmem:[#allocation10 + $0x48] ss:$16 sps:$4 sm:$0xff]   ;;  %v4270_v0 = vld [vmem:[#allocation10 + $0x64] ss:$16 sps:$4 sm:$0xff]   ;;  %v4272_v33 = vld [vmem:[#allocation10 + $0x6c] ss:$16 sps:$4 sm:$0xff]  }
 0x261   :  { %3621 = vtanh.f32 %v1099_v12  ;;  %v4240_v12 = vld [vmem:[#allocation10 + $0x8] ss:$16 sps:$4 sm:$0xff]  }
 0x262   :  { %3623 = vtanh.f32 %v1110_v34  ;;  %v4274_v34 = vld [vmem:[#allocation10 + $0x60] ss:$16 sps:$4 sm:$0xff]  }
 0x269   :  { %v3618_v20 = vpop.eup %3617 }
 0x26a   :  { %v3620_v24 = vpop.eup %3619  ;;  %v1103_v21 = vmul.f32 0.5, %v3618_v20  ;;  %v4276_v20 = vld [vmem:[#allocation10 + $0x68] ss:$16 sps:$4 sm:$0xff]  }
 0x26b   :  { %v1107_v26 = vmul.f32 0.5, %v3620_v24  ;;  %v3622_v25 = vpop.eup %3621  ;;  %v4282_v24 = vld [vmem:[#allocation10 + $0x84] ss:$16 sps:$4 sm:$0xff]  }
 0x26c   :  { %v1104_v27 = vadd.f32 0.5, %v1103_v21  ;;  %v3624_v11 = vpop.eup %3623  ;;  %v4284_v21 = vld [vmem:[#allocation10 + $0x8c] ss:$16 sps:$4 sm:$0xff]  }
 0x26d   :  { %v1108_v28 = vadd.f32 0.5, %v1107_v26  ;;  %v1112_v35 = vmul.f32 0.5, %v3624_v11  ;;  %v4286_v26 = vld [vmem:[#allocation10 + $0x80] ss:$16 sps:$4 sm:$0xff]   ;;  %v4308_v11 = vld [vmem:[#allocation10 + $0xcc] ss:$16 sps:$4 sm:$0xff]  }
 0x26e   :  { %v1116_v7 = vmul.f32 %v3622_v25, %v1104_v27  ;;  %v4288_v27 = vld [vmem:[#allocation10 + $0x88] ss:$16 sps:$4 sm:$0xff]   ;;  %v4294_v25 = vld [vmem:[#allocation10 + $0xa4] ss:$16 sps:$4 sm:$0xff]  }
 0x26f   :  { %v1115_v29 = vmul.f32 %v1108_v28, %v4147_v53  ;;  %v1113_v22 = vadd.f32 0.5, %v1112_v35  ;;  %v4236_v53 = vld [vmem:[#allocation10 + $0xc] ss:$16 sps:$4 sm:$0xff]   ;;  %v4310_v35 = vld [vmem:[#allocation10 + $0xc0] ss:$16 sps:$4 sm:$0xff]  }
 0x270   :  { %v4296_v28 = vld [vmem:[#allocation10 + $0xac] ss:$16 sps:$4 sm:$0xff]  }
 0x271   :  { %v4189_v9 = vadd.f32 %v1116_v7, %v1115_v29  ;;  %v4298_v7 = vld [vmem:[#allocation10 + $0xa0] ss:$16 sps:$4 sm:$0xff]   ;;  %v4300_v29 = vld [vmem:[#allocation10 + $0xa8] ss:$16 sps:$4 sm:$0xff]  }
 0x273   :  { %3625 = vtanh.f32 %v4189_v9 }
 0x27d   :  { %v3626_v10 = vpop.eup %3625 }
 0x27e   :  { %v1120_v13 = vmul.f32 %v3626_v10, %v1113_v22  ;;  %v4312_v22 = vld [vmem:[#allocation10 + $0xc8] ss:$16 sps:$4 sm:$0xff]   ;;  %v4318_v10 = vld [vmem:[#allocation10 + $0xe4] ss:$16 sps:$4 sm:$0xff]  }
 0x280   :  { %v1130_v6 = vpack.c.bf16 %v1120_v13, %v1120_v13  ;;  %v4320_v13 = vld [vmem:[#allocation10 + $0xec] ss:$16 sps:$4 sm:$0xff]  }
 0x282   :  { %1356 = vmatmul.mubr.bf16.vlgmr.msra.gmra.mrb[24].mxu0 %v1130_v6  ;;  %1397 = vmatmul.mubr.bf16.vlgmr.msra.gmra.mrb[24].mxu1 %v1130_v6  ;;  %v4322_v6 = vld [vmem:[#allocation10 + $0xe0] ss:$16 sps:$4 sm:$0xff]  }
 0x283   :  { %1632 = vmatpush1.bf16.msra.mxu0 %v3926_v36  ;;  %1673 = vmatpush1.bf16.msra.mxu1 %v3928_v37 }
 0x284   :  { %1633 = vmatprep.subr.bf16.mxu0 %v3932_v38  ;;  %1674 = vmatprep.subr.bf16.mxu1 %v3934_v39 }
 0x285   :  { %1663 = vmatprep.mubr.bf16.mxu0 %v4514_v30  ;;  %1704 = vmatprep.mubr.bf16.mxu1 %v4514_v30 }
 0x287   :  { %1634 = vmatpush1.bf16.msra.mxu0 %v3936_v40  ;;  %1675 = vmatpush1.bf16.msra.mxu1 %v3940_v41 }
 0x288   :  { %1635 = vmatprep.subr.bf16.mxu0 %v3944_v42  ;;  %1676 = vmatprep.subr.bf16.mxu1 %v3946_v43  ;;  %v4515_v43 = vld [vmem:[#allocation18_spill] sm:$0xff] }
 0x28b   :  { %1636 = vmatpush1.bf16.msra.mxu0 %v3950_v45  ;;  %1677 = vmatpush1.bf16.msra.mxu1 %v3952_v46 }
 0x28c   :  { %1637 = vmatprep.subr.bf16.mxu0 %v3956_v47  ;;  %1678 = vmatprep.subr.bf16.mxu1 %v3960_v48 }
 0x28f   :  { %1638 = vmatpush1.bf16.msra.mxu0 %v3962_v49  ;;  %1679 = vmatpush1.bf16.msra.mxu1 %v3964_v50 }
 0x290   :  { %1639 = vmatprep.subr.bf16.mxu0 %v3968_v51  ;;  %1680 = vmatprep.subr.bf16.mxu1 %v3972_v52 }
 0x293   :  { %1640 = vmatpush1.bf16.msra.mxu0 %v3976_v54  ;;  %1681 = vmatpush1.bf16.msra.mxu1 %v3978_v55 }
 0x294   :  { %1641 = vmatprep.subr.bf16.mxu0 %v3980_v56  ;;  %1682 = vmatprep.subr.bf16.mxu1 %v3982_v57 }
 0x297   :  { %1642 = vmatpush1.bf16.msra.mxu0 %v3988_v58  ;;  %1683 = vmatpush1.bf16.msra.mxu1 %v3990_v59 }
 0x298   :  { %1643 = vmatprep.subr.bf16.mxu0 %v3992_v60  ;;  %1684 = vmatprep.subr.bf16.mxu1 %v3994_v61 }
 0x29b   :  { %1644 = vmatpush1.bf16.msra.mxu0 %v4002_v63  ;;  %1685 = vmatpush1.bf16.msra.mxu1 %v4004_v1 }
 0x29c   :  { %1645 = vmatprep.subr.bf16.mxu0 %v4006_v2  ;;  %1686 = vmatprep.subr.bf16.mxu1 %v4008_v3 }
 0x29f   :  { %1646 = vmatpush1.bf16.msra.mxu0 %v4014_v4  ;;  %1687 = vmatpush1.bf16.msra.mxu1 %v4016_v5 }
 0x2a0   :  { %1980 = vmatprep.subr.bf16.mxu1 %v4236_v53 }
 0x355   :  { %v1357_v36 = vpop.f32.mrb[24].mxu0  ;;  %v1398_v37 = vpop.f32.mrb[24].mxu1 }
 0x356   :  { %v1405_v38 = vadd.f32 %v1357_v36, %v4083_v32  ;;  %v1407_v39 = vadd.f32 %v1398_v37, %v4086_v44  ;;  %v1359_v40 = vpop.f32.mrb[25].mxu0  ;;  %v1400_v41 = vpop.f32.mrb[25].mxu1  ;;  %v4324_v36 = vld [vmem:[#allocation10 + $0xe8] ss:$16 sps:$4 sm:$0xff]  }
 0x357   :  { %v1406_v42 = vadd.f32 %v1359_v40, %v4088_v62  ;;  %v1408_v45 = vadd.f32 %v1400_v41, %v4515_v43  ;;  %v1361_v46 = vpop.f32.mrb[26].mxu0  ;;  %v1402_v47 = vpop.f32.mrb[26].mxu1  ;;  %v4234_v62 = vld [vmem:[#allocation10 + $0x4] ss:$16 sps:$4 sm:$0xff]   ;;  %v4517_v41 = vld [vmem:[#allocation20_spill] sm:$0xff] }
 0x358   :  { %v1409_v48 = vmul.f32 0.5, %v1405_v38  ;;  %v1362_v49 = vpop.f32.mrb[27].mxu0  ;;  %v1403_v50 = vpop.f32.mrb[27].mxu1  ;;  %1939 = vmatprep.subr.bf16.mxu0 %v4234_v62  ;;  %v4518_v46 = vld [vmem:[#allocation21_spill] sm:$0xff] }
 0x359   :  { %v1413_v51 = vmul.f32 0.5, %v1406_v42  ;;  %v1418_v52 = vmul.f32 0.5, %v1408_v45 }
 0x35a   :  { %3627 = vtanh.f32 %v1409_v48  ;;  %v4519_v48 = vld [vmem:[#allocation22_spill] sm:$0xff] }
 0x35b   :  { %3629 = vtanh.f32 %v1413_v51 }
 0x35c   :  { %3631 = vtanh.f32 %v1407_v39  ;;  %v4516_v39 = vld [vmem:[#allocation19_spill] sm:$0xff] }
 0x35d   :  { %3633 = vtanh.f32 %v1418_v52 }
 0x364   :  { %v3628_v54 = vpop.eup %3627 }
 0x365   :  { %v3630_v55 = vpop.eup %3629  ;;  %v1411_v56 = vmul.f32 0.5, %v3628_v54 }
 0x366   :  { %v1415_v57 = vmul.f32 0.5, %v3630_v55  ;;  %v3632_v59 = vpop.eup %3631 }
 0x367   :  { %v1412_v58 = vadd.f32 0.5, %v1411_v56  ;;  %v3634_v2 = vpop.eup %3633 }
 0x368   :  { %v1416_v60 = vadd.f32 0.5, %v1415_v57  ;;  %v1420_v3 = vmul.f32 0.5, %v3634_v2 }
 0x369   :  { %v1424_v61 = vmul.f32 %v3632_v59, %v1412_v58 }
 0x36a   :  { %v1423_v63 = vmul.f32 %v1416_v60, %v4189_v9  ;;  %v1421_v4 = vadd.f32 0.5, %v1420_v3  ;;  %v4306_v9 = vld [vmem:[#allocation10 + $0xc4] ss:$16 sps:$4 sm:$0xff]  }
 0x36c   :  { %v4229_v1 = vadd.f32 %v1424_v61, %v1423_v63 }
 0x36e   :  { %3635 = vtanh.f32 %v4229_v1 }
 0x378   :  { %v3636_v5 = vpop.eup %3635 }
 0x379   :  { %v1428_v32 = vmul.f32 %v3636_v5, %v1421_v4 }
 0x37b   :  { %v1438_v44 = vpack.c.bf16 %v1428_v32, %v1428_v32 }
 0x37d   :  { %1664 = vmatmul.mubr.bf16.vlgmr.msra.gmra.mrb[28].mxu0 %v1438_v44  ;;  %1705 = vmatmul.mubr.bf16.vlgmr.msra.gmra.mrb[28].mxu1 %v1438_v44 }
 0x37e   :  { %1971 = vmatprep.mubr.bf16.mxu0 %v4514_v30  ;;  %2012 = vmatprep.mubr.bf16.mxu1 %v4514_v30 }
 0x37f   :  { %1940 = vmatpush1.bf16.msra.mxu0 %v4238_v8  ;;  %1981 = vmatpush1.bf16.msra.mxu1 %v4240_v12 }
 0x380   :  { %1941 = vmatprep.subr.bf16.mxu0 %v4246_v23  ;;  %1982 = vmatprep.subr.bf16.mxu1 %v4248_v31 }
 0x383   :  { %1942 = vmatpush1.bf16.msra.mxu0 %v4250_v15  ;;  %1983 = vmatpush1.bf16.msra.mxu1 %v4252_v14 }
 0x384   :  { %1943 = vmatprep.subr.bf16.mxu0 %v4258_v16  ;;  %1984 = vmatprep.subr.bf16.mxu1 %v4260_v17 }
 0x387   :  { %1944 = vmatpush1.bf16.msra.mxu0 %v4262_v18  ;;  %1985 = vmatpush1.bf16.msra.mxu1 %v4264_v19 }
 0x388   :  { %1945 = vmatprep.subr.bf16.mxu0 %v4270_v0  ;;  %1986 = vmatprep.subr.bf16.mxu1 %v4272_v33 }
 0x38b   :  { %1946 = vmatpush1.bf16.msra.mxu0 %v4274_v34  ;;  %1987 = vmatpush1.bf16.msra.mxu1 %v4276_v20 }
 0x38c   :  { %1947 = vmatprep.subr.bf16.mxu0 %v4282_v24  ;;  %1988 = vmatprep.subr.bf16.mxu1 %v4284_v21 }
 0x38f   :  { %1948 = vmatpush1.bf16.msra.mxu0 %v4286_v26  ;;  %1989 = vmatpush1.bf16.msra.mxu1 %v4288_v27 }
 0x390   :  { %1949 = vmatprep.subr.bf16.mxu0 %v4294_v25  ;;  %1990 = vmatprep.subr.bf16.mxu1 %v4296_v28 }
 0x393   :  { %1950 = vmatpush1.bf16.msra.mxu0 %v4298_v7  ;;  %1991 = vmatpush1.bf16.msra.mxu1 %v4300_v29 }
 0x394   :  { %1951 = vmatprep.subr.bf16.mxu0 %v4306_v9  ;;  %1992 = vmatprep.subr.bf16.mxu1 %v4308_v11 }
 0x397   :  { %1952 = vmatpush1.bf16.msra.mxu0 %v4310_v35  ;;  %1993 = vmatpush1.bf16.msra.mxu1 %v4312_v22 }
 0x398   :  { %1953 = vmatprep.subr.bf16.mxu0 %v4318_v10  ;;  %1994 = vmatprep.subr.bf16.mxu1 %v4320_v13 }
 0x39b   :  { %1954 = vmatpush1.bf16.msra.mxu0 %v4322_v6  ;;  %1995 = vmatpush1.bf16.msra.mxu1 %v4324_v36 }
 0x39c   :  { %2247 = vmatprep.subr.bf16.mxu0 %v4234_v62  ;;  %2288 = vmatprep.subr.bf16.mxu1 %v4236_v53 }
 0x450   :  { %v1665_v37 = vpop.f32.mrb[28].mxu0  ;;  %v1706_v38 = vpop.f32.mrb[28].mxu1 }
 0x451   :  { %v1713_v40 = vadd.f32 %v1665_v37, %v4516_v39  ;;  %v1715_v42 = vadd.f32 %v1706_v38, %v4517_v41  ;;  %v1667_v43 = vpop.f32.mrb[29].mxu0  ;;  %v1708_v45 = vpop.f32.mrb[29].mxu1 }
 0x452   :  { %v1714_v47 = vadd.f32 %v1667_v43, %v4518_v46  ;;  %v1716_v49 = vadd.f32 %v1708_v45, %v4519_v48  ;;  %v1669_v50 = vpop.f32.mrb[30].mxu0  ;;  %v1710_v51 = vpop.f32.mrb[30].mxu1  ;;  %v4520_v43 = vld [vmem:[#allocation23_spill] sm:$0xff]  ;;  %v4521_v46 = vld [vmem:[#allocation24_spill] sm:$0xff] }
 0x453   :  { %v1717_v52 = vmul.f32 0.5, %v1713_v40  ;;  %v1670_v54 = vpop.f32.mrb[31].mxu0  ;;  %v1711_v55 = vpop.f32.mrb[31].mxu1  ;;  %v4522_v50 = vld [vmem:[#allocation25_spill] sm:$0xff] }
 0x454   :  { %v1721_v56 = vmul.f32 0.5, %v1714_v47  ;;  %v1726_v57 = vmul.f32 0.5, %v1716_v49 }
 0x455   :  { %3637 = vtanh.f32 %v1717_v52  ;;  %v4523_v52 = vld [vmem:[#allocation26_spill] sm:$0xff] }
 0x456   :  { %3639 = vtanh.f32 %v1721_v56 }
 0x457   :  { %3641 = vtanh.f32 %v1715_v42 }
 0x458   :  { %3643 = vtanh.f32 %v1726_v57 }
 0x45f   :  { %v3638_v58 = vpop.eup %3637 }
 0x460   :  { %v3640_v59 = vpop.eup %3639  ;;  %v1719_v60 = vmul.f32 0.5, %v3638_v58 }
 0x461   :  { %v1723_v61 = vmul.f32 0.5, %v3640_v59  ;;  %v3642_v2 = vpop.eup %3641 }
 0x462   :  { %v1720_v63 = vadd.f32 0.5, %v1719_v60  ;;  %v3644_v44 = vpop.eup %3643 }
 0x463   :  { %v1724_v3 = vadd.f32 0.5, %v1723_v61  ;;  %v1728_v37 = vmul.f32 0.5, %v3644_v44 }
 0x464   :  { %v1732_v4 = vmul.f32 %v3642_v2, %v1720_v63 }
 0x465   :  { %v1731_v5 = vmul.f32 %v1724_v3, %v4229_v1  ;;  %v1729_v38 = vadd.f32 0.5, %v1728_v37 }
 0x467   :  { %v4337_v32 = vadd.f32 %v1732_v4, %v1731_v5 }
 0x469   :  { %3645 = vtanh.f32 %v4337_v32 }
 0x473   :  { %v3646_v39 = vpop.eup %3645 }
 0x474   :  { %v1736_v40 = vmul.f32 %v3646_v39, %v1729_v38 }
 0x476   :  { %v1746_v41 = vpack.c.bf16 %v1736_v40, %v1736_v40 }
 0x478   :  { %1972 = vmatmul.mubr.bf16.vlgmr.msra.gmra.mrb[32].mxu0 %v1746_v41  ;;  %2013 = vmatmul.mubr.bf16.vlgmr.msra.gmra.mrb[32].mxu1 %v1746_v41 }
 0x479   :  { %2248 = vmatpush1.bf16.msra.mxu0 %v4238_v8  ;;  %2289 = vmatpush1.bf16.msra.mxu1 %v4240_v12 }
 0x47a   :  { %2249 = vmatprep.subr.bf16.mxu0 %v4246_v23  ;;  %2290 = vmatprep.subr.bf16.mxu1 %v4248_v31 }
 0x47b   :  { %2279 = vmatprep.mubr.bf16.mxu0 %v4514_v30  ;;  %2320 = vmatprep.mubr.bf16.mxu1 %v4514_v30 }
 0x47d   :  { %2250 = vmatpush1.bf16.msra.mxu0 %v4250_v15  ;;  %2291 = vmatpush1.bf16.msra.mxu1 %v4252_v14 }
 0x47e   :  { %2251 = vmatprep.subr.bf16.mxu0 %v4258_v16  ;;  %2292 = vmatprep.subr.bf16.mxu1 %v4260_v17 }
 0x481   :  { %2252 = vmatpush1.bf16.msra.mxu0 %v4262_v18  ;;  %2293 = vmatpush1.bf16.msra.mxu1 %v4264_v19 }
 0x482   :  { %2253 = vmatprep.subr.bf16.mxu0 %v4270_v0  ;;  %2294 = vmatprep.subr.bf16.mxu1 %v4272_v33 }
 0x485   :  { %2254 = vmatpush1.bf16.msra.mxu0 %v4274_v34  ;;  %2295 = vmatpush1.bf16.msra.mxu1 %v4276_v20 }
 0x486   :  { %2255 = vmatprep.subr.bf16.mxu0 %v4282_v24  ;;  %2296 = vmatprep.subr.bf16.mxu1 %v4284_v21 }
 0x489   :  { %2256 = vmatpush1.bf16.msra.mxu0 %v4286_v26  ;;  %2297 = vmatpush1.bf16.msra.mxu1 %v4288_v27 }
 0x48a   :  { %2257 = vmatprep.subr.bf16.mxu0 %v4294_v25  ;;  %2298 = vmatprep.subr.bf16.mxu1 %v4296_v28 }
 0x48d   :  { %2258 = vmatpush1.bf16.msra.mxu0 %v4298_v7  ;;  %2299 = vmatpush1.bf16.msra.mxu1 %v4300_v29 }
 0x48e   :  { %2259 = vmatprep.subr.bf16.mxu0 %v4306_v9  ;;  %2300 = vmatprep.subr.bf16.mxu1 %v4308_v11 }
 0x491   :  { %2260 = vmatpush1.bf16.msra.mxu0 %v4310_v35  ;;  %2301 = vmatpush1.bf16.msra.mxu1 %v4312_v22 }
 0x492   :  { %2261 = vmatprep.subr.bf16.mxu0 %v4318_v10  ;;  %2302 = vmatprep.subr.bf16.mxu1 %v4320_v13 }
 0x495   :  { %2262 = vmatpush1.bf16.msra.mxu0 %v4322_v6  ;;  %2303 = vmatpush1.bf16.msra.mxu1 %v4324_v36 }
 0x496   :  { %2555 = vmatprep.subr.bf16.mxu0 %v4234_v62  ;;  %2596 = vmatprep.subr.bf16.mxu1 %v4236_v53 }
 0x54b   :  { %v1973_v1 = vpop.f32.mrb[32].mxu0  ;;  %v2014_v42 = vpop.f32.mrb[32].mxu1 }
 0x54c   :  { %v2021_v45 = vadd.f32 %v1973_v1, %v4520_v43  ;;  %v2023_v47 = vadd.f32 %v2014_v42, %v4521_v46  ;;  %v1975_v48 = vpop.f32.mrb[33].mxu0  ;;  %v2016_v49 = vpop.f32.mrb[33].mxu1 }
 0x54d   :  { %v2022_v51 = vadd.f32 %v1975_v48, %v4522_v50  ;;  %v2024_v54 = vadd.f32 %v2016_v49, %v4523_v52  ;;  %v1977_v55 = vpop.f32.mrb[34].mxu0  ;;  %v2018_v56 = vpop.f32.mrb[34].mxu1  ;;  %v4524_v48 = vld [vmem:[#allocation27_spill] sm:$0xff]  ;;  %v4525_v50 = vld [vmem:[#allocation28_spill] sm:$0xff] }
 0x54e   :  { %v2025_v57 = vmul.f32 0.5, %v2021_v45  ;;  %v1978_v58 = vpop.f32.mrb[35].mxu0  ;;  %v2019_v59 = vpop.f32.mrb[35].mxu1  ;;  %v4526_v55 = vld [vmem:[#allocation29_spill] sm:$0xff] }
 0x54f   :  { %v2029_v60 = vmul.f32 0.5, %v2022_v51  ;;  %v2034_v61 = vmul.f32 0.5, %v2024_v54 }
 0x550   :  { %3647 = vtanh.f32 %v2025_v57  ;;  %v4527_v57 = vld [vmem:[#allocation30_spill] sm:$0xff] }
 0x551   :  { %3649 = vtanh.f32 %v2029_v60 }
 0x552   :  { %3651 = vtanh.f32 %v2023_v47 }
 0x553   :  { %3653 = vtanh.f32 %v2034_v61 }
 0x55a   :  { %v3648_v63 = vpop.eup %3647 }
 0x55b   :  { %v3650_v2 = vpop.eup %3649  ;;  %v2027_v3 = vmul.f32 0.5, %v3648_v63 }
 0x55c   :  { %v2031_v4 = vmul.f32 0.5, %v3650_v2  ;;  %v3652_v44 = vpop.eup %3651 }
 0x55d   :  { %v2028_v5 = vadd.f32 0.5, %v2027_v3  ;;  %v3654_v41 = vpop.eup %3653 }
 0x55e   :  { %v2032_v37 = vadd.f32 0.5, %v2031_v4  ;;  %v2036_v1 = vmul.f32 0.5, %v3654_v41 }
 0x55f   :  { %v2040_v38 = vmul.f32 %v3652_v44, %v2028_v5 }
 0x560   :  { %v2039_v39 = vmul.f32 %v2032_v37, %v4337_v32  ;;  %v2037_v42 = vadd.f32 0.5, %v2036_v1 }
 0x562   :  { %v4379_v40 = vadd.f32 %v2040_v38, %v2039_v39 }
 0x564   :  { %3655 = vtanh.f32 %v4379_v40 }
 0x56e   :  { %v3656_v43 = vpop.eup %3655 }
 0x56f   :  { %v2044_v45 = vmul.f32 %v3656_v43, %v2037_v42 }
 0x571   :  { %v2054_v46 = vpack.c.bf16 %v2044_v45, %v2044_v45 }
 0x573   :  { %2280 = vmatmul.mubr.bf16.vlgmr.msra.gmra.mrb[36].mxu0 %v2054_v46  ;;  %2321 = vmatmul.mubr.bf16.vlgmr.msra.gmra.mrb[36].mxu1 %v2054_v46 }
 0x574   :  { %2556 = vmatpush1.bf16.msra.mxu0 %v4238_v8  ;;  %2597 = vmatpush1.bf16.msra.mxu1 %v4240_v12 }
 0x575   :  { %2557 = vmatprep.subr.bf16.mxu0 %v4246_v23  ;;  %2598 = vmatprep.subr.bf16.mxu1 %v4248_v31 }
 0x576   :  { %2587 = vmatprep.mubr.bf16.mxu0 %v4514_v30  ;;  %2628 = vmatprep.mubr.bf16.mxu1 %v4514_v30 }
 0x578   :  { %2558 = vmatpush1.bf16.msra.mxu0 %v4250_v15  ;;  %2599 = vmatpush1.bf16.msra.mxu1 %v4252_v14 }
 0x579   :  { %2559 = vmatprep.subr.bf16.mxu0 %v4258_v16  ;;  %2600 = vmatprep.subr.bf16.mxu1 %v4260_v17 }
 0x57c   :  { %2560 = vmatpush1.bf16.msra.mxu0 %v4262_v18  ;;  %2601 = vmatpush1.bf16.msra.mxu1 %v4264_v19 }
 0x57d   :  { %2561 = vmatprep.subr.bf16.mxu0 %v4270_v0  ;;  %2602 = vmatprep.subr.bf16.mxu1 %v4272_v33 }
 0x580   :  { %2562 = vmatpush1.bf16.msra.mxu0 %v4274_v34  ;;  %2603 = vmatpush1.bf16.msra.mxu1 %v4276_v20 }
 0x581   :  { %2563 = vmatprep.subr.bf16.mxu0 %v4282_v24  ;;  %2604 = vmatprep.subr.bf16.mxu1 %v4284_v21 }
 0x584   :  { %2564 = vmatpush1.bf16.msra.mxu0 %v4286_v26  ;;  %2605 = vmatpush1.bf16.msra.mxu1 %v4288_v27 }
 0x585   :  { %2565 = vmatprep.subr.bf16.mxu0 %v4294_v25  ;;  %2606 = vmatprep.subr.bf16.mxu1 %v4296_v28 }
 0x588   :  { %2566 = vmatpush1.bf16.msra.mxu0 %v4298_v7  ;;  %2607 = vmatpush1.bf16.msra.mxu1 %v4300_v29 }
 0x589   :  { %2567 = vmatprep.subr.bf16.mxu0 %v4306_v9  ;;  %2608 = vmatprep.subr.bf16.mxu1 %v4308_v11 }
 0x58c   :  { %2568 = vmatpush1.bf16.msra.mxu0 %v4310_v35  ;;  %2609 = vmatpush1.bf16.msra.mxu1 %v4312_v22 }
 0x58d   :  { %2569 = vmatprep.subr.bf16.mxu0 %v4318_v10  ;;  %2610 = vmatprep.subr.bf16.mxu1 %v4320_v13 }
 0x590   :  { %2570 = vmatpush1.bf16.msra.mxu0 %v4322_v6  ;;  %2611 = vmatpush1.bf16.msra.mxu1 %v4324_v36 }
 0x591   :  { %2863 = vmatprep.subr.bf16.mxu0 %v4234_v62  ;;  %2904 = vmatprep.subr.bf16.mxu1 %v4236_v53 }
 0x646   :  { %v2281_v32 = vpop.f32.mrb[36].mxu0  ;;  %v2322_v47 = vpop.f32.mrb[36].mxu1 }
 0x647   :  { %v2329_v49 = vadd.f32 %v2281_v32, %v4524_v48  ;;  %v2331_v51 = vadd.f32 %v2322_v47, %v4525_v50  ;;  %v2283_v52 = vpop.f32.mrb[37].mxu0  ;;  %v2324_v54 = vpop.f32.mrb[37].mxu1 }
 0x648   :  { %v2330_v56 = vadd.f32 %v2283_v52, %v4526_v55  ;;  %v2332_v58 = vadd.f32 %v2324_v54, %v4527_v57  ;;  %v2285_v59 = vpop.f32.mrb[38].mxu0  ;;  %v2326_v60 = vpop.f32.mrb[38].mxu1  ;;  %v3599_v52 = vld [vmem:[#allocation11] sm:$0xff]   ;;  %v3815_v54 = vmov 0.0   ;;  %v3600_v55 = vld [vmem:[#allocation11 + $0x8] sm:$0xff]   ;;  %v3602_v57 = vld [vmem:[#allocation11 + $0x18] sm:$0xff]  }
 0x649   :  { %v2333_v61 = vmul.f32 0.5, %v2329_v49  ;;  %v2286_v63 = vpop.f32.mrb[39].mxu0  ;;  %v2327_v2 = vpop.f32.mrb[39].mxu1  ;;  %v3604_v59 = vld [vmem:[#allocation11 + $0x28] sm:$0xff]   ;;  %v3605_v60 = vld [vmem:[#allocation11 + $0x30] sm:$0xff]  }
 0x64a   :  { %v2337_v62 = vmul.f32 0.5, %v2330_v56  ;;  %v2342_v53 = vmul.f32 0.5, %v2332_v58  ;;  %v3601_v56 = vld [vmem:[#allocation11 + $0x10] sm:$0xff]   ;;  %v3603_v58 = vld [vmem:[#allocation11 + $0x20] sm:$0xff]  }
 0x64b   :  { %3657 = vtanh.f32 %v2333_v61  ;;  %v3606_v61 = vld [vmem:[#allocation11 + $0x38] sm:$0xff]  }
 0x64c   :  { %3659 = vtanh.f32 %v2337_v62  ;;  %v4532_v62 = vld [vmem:[#allocation35_spill] sm:$0xff] }
 0x64d   :  { %3661 = vtanh.f32 %v2331_v51 }
 0x64e   :  { %3663 = vtanh.f32 %v2342_v53 }
 0x655   :  { %v3658_v3 = vpop.eup %3657 }
 0x656   :  { %v3660_v4 = vpop.eup %3659  ;;  %v2335_v5 = vmul.f32 0.5, %v3658_v3  ;;  %v4533_v3 = vld [vmem:[#allocation36_spill] sm:$0xff] }
 0x657   :  { %v2339_v44 = vmul.f32 0.5, %v3660_v4  ;;  %v3662_v38 = vpop.eup %3661 }
 0x658   :  { %v2336_v37 = vadd.f32 0.5, %v2335_v5  ;;  %v3664_v43 = vpop.eup %3663 }
 0x659   :  { %v2340_v39 = vadd.f32 0.5, %v2339_v44  ;;  %v2344_v45 = vmul.f32 0.5, %v3664_v43 }
 0x65a   :  { %v2348_v41 = vmul.f32 %v3662_v38, %v2336_v37  ;;  %v4534_v37 = vld [vmem:[#allocation37_spill] sm:$0xff] }
 0x65b   :  { %v2347_v1 = vmul.f32 %v2340_v39, %v4379_v40  ;;  %v2345_v46 = vadd.f32 0.5, %v2344_v45  ;;  %v4535_v39 = vld [vmem:[#allocation38_spill] sm:$0xff] }
 0x65d   :  { %v4421_v42 = vadd.f32 %v2348_v41, %v2347_v1 }
 0x65f   :  { %3665 = vtanh.f32 %v4421_v42 }
 0x669   :  { %v3666_v32 = vpop.eup %3665 }
 0x66a   :  { %v2352_v47 = vmul.f32 %v3666_v32, %v2345_v46 }
 0x66c   :  { %v2362_v48 = vpack.c.bf16 %v2352_v47, %v2352_v47 }
 0x66e   :  { %2588 = vmatmul.mubr.bf16.vlgmr.msra.gmra.mrb[40].mxu0 %v2362_v48  ;;  %2629 = vmatmul.mubr.bf16.vlgmr.msra.gmra.mrb[40].mxu1 %v2362_v48 }
 0x66f   :  { %2864 = vmatpush1.bf16.msra.mxu0 %v4238_v8  ;;  %2905 = vmatpush1.bf16.msra.mxu1 %v4240_v12  ;;  %v4528_v12 = vld [vmem:[#allocation31_spill] sm:$0xff] }
 0x670   :  { %2865 = vmatprep.subr.bf16.mxu0 %v4246_v23  ;;  %2906 = vmatprep.subr.bf16.mxu1 %v4248_v31  ;;  %v4529_v31 = vld [vmem:[#allocation32_spill] sm:$0xff] }
 0x671   :  { %2895 = vmatprep.mubr.bf16.mxu0 %v4514_v30  ;;  %2936 = vmatprep.mubr.bf16.mxu1 %v4514_v30 }
 0x673   :  { %2866 = vmatpush1.bf16.msra.mxu0 %v4250_v15  ;;  %2907 = vmatpush1.bf16.msra.mxu1 %v4252_v14 }
 0x674   :  { %2867 = vmatprep.subr.bf16.mxu0 %v4258_v16  ;;  %2908 = vmatprep.subr.bf16.mxu1 %v4260_v17  ;;  %v4530_v17 = vld [vmem:[#allocation33_spill] sm:$0xff] }
 0x677   :  { %2868 = vmatpush1.bf16.msra.mxu0 %v4262_v18  ;;  %2909 = vmatpush1.bf16.msra.mxu1 %v4264_v19  ;;  %v4531_v19 = vld [vmem:[#allocation34_spill] sm:$0xff] }
 0x678   :  { %2869 = vmatprep.subr.bf16.mxu0 %v4270_v0  ;;  %2910 = vmatprep.subr.bf16.mxu1 %v4272_v33 }
 0x67b   :  { %2870 = vmatpush1.bf16.msra.mxu0 %v4274_v34  ;;  %2911 = vmatpush1.bf16.msra.mxu1 %v4276_v20 }
 0x67c   :  { %2871 = vmatprep.subr.bf16.mxu0 %v4282_v24  ;;  %2912 = vmatprep.subr.bf16.mxu1 %v4284_v21 }
 0x67f   :  { %2872 = vmatpush1.bf16.msra.mxu0 %v4286_v26  ;;  %2913 = vmatpush1.bf16.msra.mxu1 %v4288_v27 }
 0x680   :  { %2873 = vmatprep.subr.bf16.mxu0 %v4294_v25  ;;  %2914 = vmatprep.subr.bf16.mxu1 %v4296_v28 }
 0x683   :  { %2874 = vmatpush1.bf16.msra.mxu0 %v4298_v7  ;;  %2915 = vmatpush1.bf16.msra.mxu1 %v4300_v29 }
 0x684   :  { %2875 = vmatprep.subr.bf16.mxu0 %v4306_v9  ;;  %2916 = vmatprep.subr.bf16.mxu1 %v4308_v11 }
 0x687   :  { %2876 = vmatpush1.bf16.msra.mxu0 %v4310_v35  ;;  %2917 = vmatpush1.bf16.msra.mxu1 %v4312_v22 }
 0x688   :  { %2877 = vmatprep.subr.bf16.mxu0 %v4318_v10  ;;  %2918 = vmatprep.subr.bf16.mxu1 %v4320_v13 }
 0x68b   :  { %2878 = vmatpush1.bf16.msra.mxu0 %v4322_v6  ;;  %2919 = vmatpush1.bf16.msra.mxu1 %v4324_v36 }
 0x68c   :  { %3418 = vmatprep.subr.bf16.mxu0 %v3815_v54 }
 0x741   :  { %v2589_v30 = vpop.f32.mrb[40].mxu0  ;;  %v2630_v8 = vpop.f32.mrb[40].mxu1 }
 0x742   :  { %v2637_v23 = vadd.f32 %v2589_v30, %v4528_v12  ;;  %v2639_v15 = vadd.f32 %v2630_v8, %v4529_v31  ;;  %v2591_v14 = vpop.f32.mrb[41].mxu0  ;;  %v2632_v16 = vpop.f32.mrb[41].mxu1 }
 0x743   :  { %v2638_v18 = vadd.f32 %v2591_v14, %v4530_v17  ;;  %v2640_v0 = vadd.f32 %v2632_v16, %v4531_v19  ;;  %v2593_v33 = vpop.f32.mrb[42].mxu0  ;;  %v2634_v34 = vpop.f32.mrb[42].mxu1 }
 0x744   :  { %v2641_v20 = vmul.f32 0.5, %v2637_v23  ;;  %v2594_v24 = vpop.f32.mrb[43].mxu0  ;;  %v2635_v21 = vpop.f32.mrb[43].mxu1 }
 0x745   :  { %v2645_v26 = vmul.f32 0.5, %v2638_v18  ;;  %v2650_v27 = vmul.f32 0.5, %v2640_v0  ;;  %v3400_v24 = vld [vmem:[%s4489_s5] ss:$0 sm:$0xff] }
 0x746   :  { %3667 = vtanh.f32 %v2641_v20 }
 0x747   :  { %3669 = vtanh.f32 %v2645_v26 }
 0x748   :  { %3671 = vtanh.f32 %v2639_v15 }
 0x749   :  { %3673 = vtanh.f32 %v2650_v27 }
 0x750   :  { %v3668_v25 = vpop.eup %3667 }
 0x751   :  { %v3670_v28 = vpop.eup %3669  ;;  %v2643_v7 = vmul.f32 0.5, %v3668_v25 }
 0x752   :  { %v2647_v29 = vmul.f32 0.5, %v3670_v28  ;;  %v3672_v11 = vpop.eup %3671 }
 0x753   :  { %v2644_v9 = vadd.f32 0.5, %v2643_v7  ;;  %v3674_v6 = vpop.eup %3673 }
 0x754   :  { %v2648_v35 = vadd.f32 0.5, %v2647_v29  ;;  %v2652_v36 = vmul.f32 0.5, %v3674_v6 }
 0x755   :  { %v2656_v22 = vmul.f32 %v3672_v11, %v2644_v9 }
 0x756   :  { %v2655_v10 = vmul.f32 %v2648_v35, %v4421_v42  ;;  %v2653_v40 = vadd.f32 0.5, %v2652_v36 }
 0x758   :  { %v4461_v13 = vadd.f32 %v2656_v22, %v2655_v10 }
 0x75a   :  { %3675 = vtanh.f32 %v4461_v13 }
 0x764   :  { %v3676_v49 = vpop.eup %3675 }
 0x765   :  { %v2660_v50 = vmul.f32 %v3676_v49, %v2653_v40 }
 0x767   :  { %v2670_v51 = vpack.c.bf16 %v2660_v50, %v2660_v50 }
 0x769   :  { %2896 = vmatmul.mubr.bf16.vlgmr.msra.gmra.mrb[44].mxu0 %v2670_v51  ;;  %2937 = vmatmul.mubr.bf16.vlgmr.msra.gmra.mrb[44].mxu1 %v2670_v51 }
 0x76a   :  { %3419 = vmatpush3.bf16.msra.mxu0 %v3599_v52  ;;  %3434 = vmatprep.mubr.msk.bf16.mxu0 %vm3816_vm0, %v3815_v54 }
 0x76b   :  { %3420 = vmatprep.subr.bf16.mxu0 %v3815_v54 }
 0x76e   :  { %3421 = vmatpush3.bf16.msra.mxu0 %v3600_v55 }
 0x76f   :  { %3422 = vmatprep.subr.bf16.mxu0 %v3815_v54 }
 0x772   :  { %3423 = vmatpush3.bf16.msra.mxu0 %v3601_v56 }
 0x773   :  { %3424 = vmatprep.subr.bf16.mxu0 %v3815_v54 }
 0x776   :  { %3425 = vmatpush3.bf16.msra.mxu0 %v3602_v57 }
 0x777   :  { %3426 = vmatprep.subr.bf16.mxu0 %v3815_v54 }
 0x77a   :  { %3427 = vmatpush3.bf16.msra.mxu0 %v3603_v58 }
 0x77b   :  { %3428 = vmatprep.subr.bf16.mxu0 %v3815_v54 }
 0x77e   :  { %3429 = vmatpush3.bf16.msra.mxu0 %v3604_v59 }
 0x77f   :  { %3430 = vmatprep.subr.bf16.mxu0 %v3815_v54 }
 0x782   :  { %3431 = vmatpush3.bf16.msra.mxu0 %v3605_v60 }
 0x783   :  { %3432 = vmatprep.subr.bf16.mxu0 %v3815_v54 }
 0x786   :  { %3433 = vmatpush3.bf16.msra.mxu0 %v3606_v61 }
 0x83c   :  { %v2897_v63 = vpop.f32.mrb[44].mxu0  ;;  %v2938_v2 = vpop.f32.mrb[44].mxu1 }
 0x83d   :  { %v2945_v53 = vadd.f32 %v2897_v63, %v4532_v62  ;;  %v2947_v4 = vadd.f32 %v2938_v2, %v4533_v3  ;;  %v2899_v5 = vpop.f32.mrb[45].mxu0  ;;  %v2940_v44 = vpop.f32.mrb[45].mxu1 }
 0x83e   :  { %v2946_v38 = vadd.f32 %v2899_v5, %v4534_v37  ;;  %v2948_v41 = vadd.f32 %v2940_v44, %v4535_v39  ;;  %v2901_v1 = vpop.f32.mrb[46].mxu0  ;;  %v2942_v42 = vpop.f32.mrb[46].mxu1 }
 0x83f   :  { %v2949_v43 = vmul.f32 0.5, %v2945_v53  ;;  %v2902_v45 = vpop.f32.mrb[47].mxu0  ;;  %v2943_v46 = vpop.f32.mrb[47].mxu1 }
 0x840   :  { %v2953_v32 = vmul.f32 0.5, %v2946_v38  ;;  %v2958_v47 = vmul.f32 0.5, %v2948_v41 }
 0x841   :  { %3677 = vtanh.f32 %v2949_v43 }
 0x842   :  { %3679 = vtanh.f32 %v2953_v32 }
 0x843   :  { %3681 = vtanh.f32 %v2947_v4 }
 0x844   :  { %3683 = vtanh.f32 %v2958_v47 }
 0x84b   :  { %v3678_v48 = vpop.eup %3677 }
 0x84c   :  { %v3680_v30 = vpop.eup %3679  ;;  %v2951_v8 = vmul.f32 0.5, %v3678_v48 }
 0x84d   :  { %v2955_v12 = vmul.f32 0.5, %v3680_v30  ;;  %v3682_v31 = vpop.eup %3681 }
 0x84e   :  { %v2952_v23 = vadd.f32 0.5, %v2951_v8  ;;  %v3684_v18 = vpop.eup %3683 }
 0x84f   :  { %v2956_v15 = vadd.f32 0.5, %v2955_v12  ;;  %v2960_v19 = vmul.f32 0.5, %v3684_v18 }
 0x850   :  { %v2964_v14 = vmul.f32 %v3682_v31, %v2952_v23 }
 0x851   :  { %v2963_v16 = vmul.f32 %v2956_v15, %v4461_v13  ;;  %v2961_v0 = vadd.f32 0.5, %v2960_v19 }
 0x853   :  { %v2965_v17 = vadd.f32 %v2964_v14, %v2963_v16 }
 0x855   :  { %3685 = vtanh.f32 %v2965_v17 }
 0x85f   :  { %v3686_v33 = vpop.eup %3685 }
 0x860   :  { %v2968_v34 = vmul.f32 %v3686_v33, %v2961_v0 }
 0x862   :  { %v2971_v20 = vpack.c.bf16 %v2968_v34, %v2968_v34 }
 0x864   :  { %3435 = vmatmul.mubr.bf16.vlgmr.msra.gmra.mrb[48].mxu0 %v2971_v20 }
 0x937   :  { %v3077_v21 = vpop.f32.mrb[48].mxu0 }
 0x938   :  { %v3078_v26 = vadd.f32 %v3400_v24, %v3077_v21  ;;  %v3436_v27 = vpop.f32.mrb[49].mxu0 }
 0x939   :  { %v3080_v25 = vpop.f32.mrb[50].mxu0 }
 0x93a   :  { %3083 = vst [vmem:[#allocation13] sm:$0xff] %v3078_v26  ;;  %v3437_v28 = vpop.f32.mrb[51].mxu0 }
 0x93b   :  { %3786 = shalt.err (!%p3783_p8)
}
 0x93c   :  { %s3787_s5 = scalar_lea.hbm %s4490_s6, 128 }
 0x93d   :  { %p3788_p9 = scmp.ne.s32.totalorder %s4490_s6, %s3787_s5  ;;  %p3791_p10 = scmp.lt.u32.totalorder %s3787_s5, %s4490_s6 }
 0x93f   :  { %p3793_p11 = pnand %p3791_p10, %p3788_p9 }
 0x941   :  { %3796 = shalt.err (!%p3793_p11)
}
 0x942   :  { %3093 = dma.vmem_to_hbm [thread:$0]  %s3091_s24, 128, %s4490_s6, [#allocation7]  }
 0x943   :  { %3803 = dma.done.wait [#allocation7], 128  }
 0x944   :  { %3804 = vsyncadd [#allocation7], 4294967168 }
 0x945   :  { %3097 = vsyncpa [#allocation6], 1 }
 0x946   :  { %3098 = vsyncpa [#allocation9], 1 }
 0x947   :  { %3099 = vsyncpa [#allocation12], 1 }
 0x948   :  { %3100 = vsyncpa [#allocation7], 1 }

</bundles_post_ra>
